<compile_context>
chip_gen: v7x
topology: tpu7x:2x2x1
jax: 0.10.0
libtpu: 0.0.40
codegen_flags: <defaults>
</compile_context>

<pallas_src>
import functools

import jax
import jax.numpy as jnp
from jax import lax
from jax.experimental import pallas as pl
from jax.experimental.pallas import tpu as pltpu


# ----------------------------------------------------------------------------
# Kernel
# ----------------------------------------------------------------------------
def se_bottleneck_kernel(H, W, Pp,
                         x_ref,        # (1, HW, Cp)   bf16
                         w1_ref,       # (Cp, Pp)      bf16, BN1 scale folded
                         w2_ref,       # (9*Pp, Pp)    bf16, BN2 scale folded, taps fused
                         w3_ref,       # (Pp, Cp)      bf16, BN3 scale folded
                         fc1wt_ref,    # (Rp, Cp)      f32  Linear(C,R).weight (padded)
                         fc1b_ref,     # (Rp, 1)       f32
                         fc2w_ref,     # (Rp, Cp)      f32  Linear(R,C).weight^T (padded)
                         vecs_ref,     # (8, Cp)       f32  packed: b1,b2,b3,fc2b,alpha
                         o_ref,        # (1, HW, Cp)   bf16
                         gathered_ref  # (HW, 9*Pp)    bf16 VMEM scratch (persistent)
                         ):
    HW = H * W
    x = x_ref[0]                                             # (HW, Cp) bf16

    b1 = vecs_ref[0:1, 0:Pp]                                 # (1, Pp)
    b2 = vecs_ref[1:2, 0:Pp]                                 # (1, Pp)
    b3 = vecs_ref[2:3, :]                                    # (1, Cp)
    fc2b = vecs_ref[3:4, :]                                  # (1, Cp)
    alpha = vecs_ref[4:5, 0:1]                               # (1, 1) PReLU alpha

    # conv1 (1x1) + folded BN1 + ReLU     (bf16 MXU, f32 accumulation)
    h1 = jnp.dot(x, w1_ref[...], preferred_element_type=jnp.float32)
    h1 = jnp.maximum(h1 + b1, 0.0)                           # (HW, Pp) f32
    h1b = h1.astype(jnp.bfloat16)                            # cast once (center tap)

    # Boundary masks generated in-kernel (no (9,HW,1) input DMA, no lane-padded
    # mask block in VMEM).  Float math avoids vector integer div/mod.
    rowf = lax.broadcasted_iota(jnp.int32, (HW, 1), 0).astype(jnp.float32)
    h_f = jnp.floor((rowf + 0.5) * (1.0 / W))                # row   index  (exact)
    w_f = rowf - h_f * W                                     # column index (exact)
    m_top = jnp.where(h_f > 0.5, 1.0, 0.0)                   # h >= 1      (dh = -1)
    m_bot = jnp.where(h_f < H - 1.5, 1.0, 0.0)               # h <= H - 2  (dh = +1)
    m_left = jnp.where(w_f > 0.5, 1.0, 0.0)                  # w >= 1      (dw = -1)
    m_right = jnp.where(w_f < W - 1.5, 1.0, 0.0)             # w <= W - 2  (dw = +1)

    # conv2 (3x3, pad=1, stride=1): spatial gather = XLU roll along HW + VPU
    # boundary mask (exact zero pad).  Each bf16 tap is written straight into
    # the persistent scratch at lane offset k*Pp, then contracted with ONE
    # K = 9*Pp MXU dot.
    k = 0
    for dh in (-1, 0, 1):
        for dw in (-1, 0, 1):
            off = dh * W + dw
            if off == 0:
                tap = h1b                                    # center tap: no mask
            else:
                m = None
                if dh == -1:
                    m = m_top
                elif dh == 1:
                    m = m_bot
                if dw == -1:
                    m = m_left if m is None else m * m_left
                elif dw == 1:
                    m = m_right if m is None else m * m_right
                shifted = pltpu.roll(h1, shift=(-off) % HW, axis=0)  # rows i -> i+off
                tap = (shifted * m).astype(jnp.bfloat16)     # (HW,1) mask bcast on lanes
            gathered_ref[:, k * Pp:(k + 1) * Pp] = tap       # lane-aligned store
            k += 1

    h2 = jnp.dot(gathered_ref[...], w2_ref[...], preferred_element_type=jnp.float32)
    h2 = jnp.maximum(h2 + b2, 0.0)                           # (HW, Pp)

    # conv3 (1x1) + folded BN3   (no ReLU before SE, matching the reference)
    h3 = jnp.dot(h2.astype(jnp.bfloat16), w3_ref[...],
                 preferred_element_type=jnp.float32) + b3    # (HW, Cp)

    # SE: global avg pool -> fc1 -> PReLU -> fc2 -> sigmoid -> channel scale.
    # M=1 FCs stay on the VPU/XLU (mul + reduce) instead of near-empty MXU tiles.
    y = jnp.mean(h3, axis=0, keepdims=True)                  # (1, Cp)
    z = jnp.sum(fc1wt_ref[...] * y, axis=1, keepdims=True) + fc1b_ref[...]   # (Rp, 1)
    z = jnp.where(z > 0.0, z, alpha * z)                     # PReLU (scalar alpha)
    s = jnp.sum(fc2w_ref[...] * z, axis=0, keepdims=True) + fc2b             # (1, Cp)
    s = jax.nn.sigmoid(s)                                    # EUP

    out = jnp.maximum(h3 * s + x.astype(jnp.float32), 0.0)   # residual add + ReLU (f32)
    o_ref[0] = out.astype(o_ref.dtype)                       # bf16 store: half the HBM


# ----------------------------------------------------------------------------
# Host-side helpers
# ----------------------------------------------------------------------------
def _round_up(n, m):
    return ((n + m - 1) // m) * m


def _pad2(a, rows, cols):
    return jnp.pad(a, ((0, rows - a.shape[0]), (0, cols - a.shape[1])))


def init_raw_params(key, inplanes, planes, reduction):
    """Parameters in the original PyTorch layouts."""
    C = planes * 4
    R = reduction
    ks = jax.random.split(key, 10)

    def bn_params(k, n):
        k1, k2, k3, k4 = jax.random.split(k, 4)
        gamma = jax.random.uniform(k1, (n,), minval=0.5, maxval=1.5)
        beta = jax.random.normal(k2, (n,)) * 0.1
        mean = jax.random.normal(k3, (n,)) * 0.1
        var = jax.random.uniform(k4, (n,), minval=0.5, maxval=1.5)
        return (gamma, beta, mean, var)

    return dict(
        conv1_w=jax.random.normal(ks[0], (planes, inplanes, 1, 1)) * 0.1,
        conv2_w=jax.random.normal(ks[1], (planes, planes, 3, 3)) * 0.1,
        conv3_w=jax.random.normal(ks[2], (C, planes, 1, 1)) * 0.1,
        bn1=bn_params(ks[3], planes),
        bn2=bn_params(ks[4], planes),
        bn3=bn_params(ks[5], C),
        fc1_w=jax.random.normal(ks[6], (R, C)) * 0.1,      # Linear(C, R).weight
        fc1_b=jax.random.normal(ks[7], (R,)) * 0.1,
        fc2_w=jax.random.normal(ks[8], (C, R)) * 0.1,      # Linear(R, C).weight
        fc2_b=jax.random.normal(ks[9], (C,)) * 0.1,
        prelu_a=jnp.asarray(0.25, jnp.float32),            # nn.PReLU() default
    )


def prepare_kernel_params(raw, eps=1e-5):
    """Fold BN, fuse 3x3 taps, pad channels to 128, cast matmul weights to bf16."""
    conv1_w, conv2_w, conv3_w = raw["conv1_w"], raw["conv2_w"], raw["conv3_w"]
    P, Cin = conv1_w.shape[0], conv1_w.shape[1]
    C = conv3_w.shape[0]
    R = raw["fc1_w"].shape[0]
    assert Cin == C, "identity residual requires inplanes == planes * expansion"

    Pp = _round_up(P, 128)
    Cp = _round_up(C, 128)
    Rp = _round_up(R, 8)

    def fold(gamma, beta, mean, var):
        s = gamma / jnp.sqrt(var + eps)
        return s, beta - mean * s

    s1, b1 = fold(*raw["bn1"])
    s2, b2 = fold(*raw["bn2"])
    s3, b3 = fold(*raw["bn3"])

    # conv1 1x1: (P, Cin) -> (Cin, P), BN1 scale folded into output channels.
    w1 = conv1_w[:, :, 0, 0].T * s1[None, :]
    w1 = _pad2(w1, Cp, Pp).astype(jnp.bfloat16)

    # conv2 3x3: (P, P, 3, 3) -> (kh, kw, ci, co), BN2 scale folded, taps fused.
    w2 = jnp.transpose(conv2_w, (2, 3, 1, 0)) * s2[None, None, None, :]
    w2p = jnp.zeros((9, Pp, Pp), jnp.float32).at[:, :P, :P].set(w2.reshape(9, P, P))
    w2f = w2p.reshape(9 * Pp, Pp).astype(jnp.bfloat16)

    # conv3 1x1: (C, P) -> (P, C), BN3 scale folded.
    w3 = conv3_w[:, :, 0, 0].T * s3[None, :]
    w3 = _pad2(w3, Pp, Cp).astype(jnp.bfloat16)

    # SE FC weights (kept in f32; evaluated on VPU/XLU in the kernel).
    fc1wt = _pad2(raw["fc1_w"], Rp, Cp).astype(jnp.float32)        # (R, C) rows = r
    fc1b = jnp.zeros((Rp, 1), jnp.float32).at[:R, 0].set(raw["fc1_b"])
    fc2w = _pad2(raw["fc2_w"].T, Rp, Cp).astype(jnp.float32)       # (C,R) -> (R,C)

    # Packed tiny per-channel vectors: b1, b2, b3, fc2 bias, PReLU alpha.
    vecs = jnp.zeros((8, Cp), jnp.float32)
    vecs = vecs.at[0, :P].set(b1).at[1, :P].set(b2)
    vecs = vecs.at[2, :C].set(b3).at[3, :C].set(raw["fc2_b"])
    vecs = vecs.at[4, 0].set(raw["prelu_a"])

    kparams = dict(w1=w1, w2=w2f, w3=w3, fc1wt=fc1wt, fc1b=fc1b, fc2w=fc2w, vecs=vecs)
    dims = dict(P=P, C=C, Pp=Pp, Cp=Cp, Rp=Rp)
    return kparams, dims


# ----------------------------------------------------------------------------
# Forward wrapper
# ----------------------------------------------------------------------------
@functools.partial(jax.jit, static_argnames=("C", "channels_last"))
def se_bottleneck_forward(x_nchw, kp, *, C, channels_last=False):
    B, Cin, H, W = x_nchw.shape
    HW = H * W
    Cp = kp["w3"].shape[1]
    Pp = kp["w1"].shape[1]
    Rp = kp["fc1wt"].shape[0]
    if Cin != C:
        raise ValueError("identity residual requires inplanes == planes * 4")
    if HW % 8 != 0:
        raise ValueError("H*W must be a multiple of 8 (sublane constraint)")

    # NCHW -> (B, HW, Cp), channels zero-padded to lane width, bf16 for the MXU.
    x = jnp.transpose(x_nchw, (0, 2, 3, 1)).reshape(B, HW, Cin)
    x = jnp.pad(x, ((0, 0), (0, 0), (0, Cp - Cin))).astype(jnp.bfloat16)

    kernel = functools.partial(se_bottleneck_kernel, H, W, Pp)
    const2 = lambda b: (0, 0)

    # Cost estimate (bf16 activations in AND out now).
    flops = 2 * B * HW * (Cp * Pp + 9 * Pp * Pp + Pp * Cp)
    weight_bf16 = kp["w1"].size + kp["w2"].size + kp["w3"].size
    weight_f32 = (kp["fc1wt"].size + kp["fc1b"].size
                  + kp["fc2w"].size + kp["vecs"].size)
    bytes_accessed = 2 * B * HW * Cp * 2 + weight_bf16 * 2 + weight_f32 * 4

    # Explicit VMEM budget from the per-step working set: double-buffered x/out
    # blocks and constants, the gathered-tap scratch, and f32 intermediates.
    act_block = HW * Cp * 2
    vmem_est = (2 * 2 * act_block                       # x + out, double-buffered
                + 2 * (weight_bf16 * 2 + weight_f32 * 4)
                + HW * 9 * Pp * 2                       # gathered bf16 scratch
                + HW * (3 * Pp + 3 * Cp) * 4)           # h1/shift/h2/h3/out f32 temps
    vmem_limit = int(min(max(vmem_est + (8 << 20), 32 << 20), 96 << 20))

    out = pl.pallas_call(
        kernel,
        out_shape=jax.ShapeDtypeStruct((B, HW, Cp), jnp.bfloat16),
        grid=(B,),
        in_specs=[
            pl.BlockSpec((1, HW, Cp), lambda b: (b, 0, 0)),   # x
            pl.BlockSpec((Cp, Pp), const2),                   # w1 (BN1 folded)
            pl.BlockSpec((9 * Pp, Pp), const2),               # w2 fused taps (BN2 folded)
            pl.BlockSpec((Pp, Cp), const2),                   # w3 (BN3 folded)
            pl.BlockSpec((Rp, Cp), const2),                   # fc1 weight
            pl.BlockSpec((Rp, 1), const2),                    # fc1 bias (column)
            pl.BlockSpec((Rp, Cp), const2),                   # fc2 weight
            pl.BlockSpec((8, Cp), const2),                    # packed biases + alpha
        ],
        out_specs=pl.BlockSpec((1, HW, Cp), lambda b: (b, 0, 0)),
        scratch_shapes=[pltpu.VMEM((HW, 9 * Pp), jnp.bfloat16)],
        compiler_params=pltpu.CompilerParams(
            dimension_semantics=("parallel",),
            vmem_limit_bytes=vmem_limit),
        cost_estimate=pl.CostEstimate(flops=int(flops),
                                      transcendentals=int(B * Cp),
                                      bytes_accessed=int(bytes_accessed)),
    )(x, kp["w1"], kp["w2"], kp["w3"],
      kp["fc1wt"], kp["fc1b"], kp["fc2w"], kp["vecs"])

    if channels_last:
        # Lane-dense bf16 NHWC output: skips the extra HBM round trip of the
        # NCHW transpose for consumers that accept channels-last.
        return out[:, :, :C].reshape(B, H, W, C)
    # NCHW consumers: slice + transpose + cast fused into one XLA op.
    return jnp.transpose(out[:, :, :C].reshape(B, H, W, C),
                         (0, 3, 1, 2)).astype(jnp.float32)


# ----------------------------------------------------------------------------
# Pure-JAX reference (f32) for correctness checking
# ----------------------------------------------------------------------------
def reference_forward(x, raw, eps=1e-5):
    hp = jax.lax.Precision.HIGHEST

    def bn(h, gamma, beta, mean, var):
        s = gamma / jnp.sqrt(var + eps)
        return h * s[None, :, None, None] + (beta - mean * s)[None, :, None, None]

    out = jnp.einsum("bchw,oc->bohw", x, raw["conv1_w"][:, :, 0, 0], precision=hp)
    out = jax.nn.relu(bn(out, *raw["bn1"]))
    out = jax.lax.conv_general_dilated(out, raw["conv2_w"], (1, 1), "SAME",
                                       dimension_numbers=("NCHW", "OIHW", "NCHW"),
                                       precision=hp)
    out = jax.nn.relu(bn(out, *raw["bn2"]))
    out = jnp.einsum("bchw,oc->bohw", out, raw["conv3_w"][:, :, 0, 0], precision=hp)
    out = bn(out, *raw["bn3"])
    # SE layer
    y = jnp.mean(out, axis=(2, 3))                               # (B, C)
    z = y @ raw["fc1_w"].T + raw["fc1_b"]
    z = jnp.where(z > 0, z, raw["prelu_a"] * z)
    s = jax.nn.sigmoid(z @ raw["fc2_w"].T + raw["fc2_b"])
    out = out * s[:, :, None, None]
    return jax.nn.relu(out + x)


# ----------------------------------------------------------------------------
if __name__ == "__main__":
    # Small shapes consistent with the module: inplanes = planes * 4 so the
    # identity residual (downsample=None, stride=1) is valid.
    B, planes, H, W = 2, 4, 8, 8
    inplanes = planes * 4
    reduction = 16

    key = jax.random.PRNGKey(0)
    kx, kparam_key = jax.random.split(key)
    x = jax.random.normal(kx, (B, inplanes, H, W), dtype=jnp.float32)

    raw = init_raw_params(kparam_key, inplanes, planes, reduction)
    kparams, dims = prepare_kernel_params(raw)

    out = se_bottleneck_forward(x, kparams, C=dims["C"])
    out = jax.block_until_ready(out)

    ref = reference_forward(x, raw)
    err = float(jnp.max(jnp.abs(out - ref)))

    assert out.shape == (B, planes * 4, H, W)
    assert bool(jnp.all(jnp.isfinite(out)))
    assert bool(jnp.all(out >= 0.0))          # final ReLU
    assert err < 5e-2, f"max abs error vs pure-JAX reference: {err}"
    print("KERNEL_OK")
</pallas_src>

<mosaic_0001>
module attributes {stable_mosaic.version = 11 : i64} {
  func.func @se_bottleneck_kernel(%arg0: i32, %arg1: memref<1x64x128xbf16, #tpu.memory_space<vmem>>, %arg2: memref<128x128xbf16, #tpu.memory_space<vmem>>, %arg3: memref<1152x128xbf16, #tpu.memory_space<vmem>>, %arg4: memref<128x128xbf16, #tpu.memory_space<vmem>>, %arg5: memref<16x128xf32, #tpu.memory_space<vmem>>, %arg6: memref<16x1xf32, #tpu.memory_space<vmem>>, %arg7: memref<16x128xf32, #tpu.memory_space<vmem>>, %arg8: memref<8x128xf32, #tpu.memory_space<vmem>>, %arg9: memref<1x64x128xbf16, #tpu.memory_space<vmem>>, %arg10: memref<64x1152xbf16, #tpu.memory_space<vmem>>) attributes {dimension_semantics = [#tpu.dimension_semantics<parallel>], iteration_bounds = array<i64: 2>, scalar_prefetch = 0 : i64, scratch_operands = 1 : i64, tpu.core_type = #tpu.core_type<tc>, window_params = [{transform_indices = @transform_0, window_bounds = array<i64: 1, 64, 128>}, {pipeline_mode = #tpu.pipeline_mode<synchronous>, transform_indices = @transform_1, window_bounds = array<i64: 128, 128>}, {pipeline_mode = #tpu.pipeline_mode<synchronous>, transform_indices = @transform_2, window_bounds = array<i64: 1152, 128>}, {pipeline_mode = #tpu.pipeline_mode<synchronous>, transform_indices = @transform_3, window_bounds = array<i64: 128, 128>}, {pipeline_mode = #tpu.pipeline_mode<synchronous>, transform_indices = @transform_4, window_bounds = array<i64: 16, 128>}, {pipeline_mode = #tpu.pipeline_mode<synchronous>, transform_indices = @transform_5, window_bounds = array<i64: 16, 1>}, {pipeline_mode = #tpu.pipeline_mode<synchronous>, transform_indices = @transform_6, window_bounds = array<i64: 16, 128>}, {pipeline_mode = #tpu.pipeline_mode<synchronous>, transform_indices = @transform_7, window_bounds = array<i64: 8, 128>}, {transform_indices = @transform_8, window_bounds = array<i64: 1, 64, 128>}]} {
    %c0 = arith.constant 0 : index
    %c0_0 = arith.constant 0 : index
    %c0_1 = arith.constant 0 : index
    %0 = vector.load %arg1[%c0, %c0_0, %c0_1] : memref<1x64x128xbf16, #tpu.memory_space<vmem>>, vector<1x64x128xbf16>
    %1 = vector.shape_cast %0 : vector<1x64x128xbf16> to vector<64x128xbf16>
    %c0_2 = arith.constant 0 : index
    %c0_3 = arith.constant 0 : index
    %2 = vector.load %arg8[%c0_2, %c0_3] : memref<8x128xf32, #tpu.memory_space<vmem>>, vector<1x128xf32>
    %c1 = arith.constant 1 : index
    %c0_4 = arith.constant 0 : index
    %3 = vector.load %arg8[%c1, %c0_4] : memref<8x128xf32, #tpu.memory_space<vmem>>, vector<1x128xf32>
    %c2 = arith.constant 2 : index
    %c0_5 = arith.constant 0 : index
    %4 = vector.load %arg8[%c2, %c0_5] : memref<8x128xf32, #tpu.memory_space<vmem>>, vector<1x128xf32>
    %c3 = arith.constant 3 : index
    %c0_6 = arith.constant 0 : index
    %5 = vector.load %arg8[%c3, %c0_6] : memref<8x128xf32, #tpu.memory_space<vmem>>, vector<1x128xf32>
    %c4 = arith.constant 4 : index
    %c0_7 = arith.constant 0 : index
    %6 = vector.load %arg8[%c4, %c0_7] : memref<8x128xf32, #tpu.memory_space<vmem>>, vector<1x1xf32>
    %c0_8 = arith.constant 0 : index
    %c0_9 = arith.constant 0 : index
    %7 = vector.load %arg2[%c0_8, %c0_9] : memref<128x128xbf16, #tpu.memory_space<vmem>>, vector<128x128xbf16>
    %cst = arith.constant dense<0.000000e+00> : vector<64x128xf32>
    %8 = tpu.matmul %1, %7, %cst {dimension_numbers = #tpu.dot_dimension_numbers<[1], [0], [0], [1], [0, 0, 1, 1], [], []>} : vector<64x128xbf16>, vector<128x128xbf16>, vector<64x128xf32> -> vector<64x128xf32>
    %9 = vector.broadcast %2 : vector<1x128xf32> to vector<64x128xf32>
    %10 = arith.addf %8, %9 : vector<64x128xf32>
    %cst_10 = arith.constant 0.000000e+00 : f32
    %11 = vector.broadcast %cst_10 : f32 to vector<64x128xf32>
    %12 = arith.maximumf %10, %11 : vector<64x128xf32>
    %13 = arith.truncf %12 : vector<64x128xf32> to vector<64x128xbf16>
    %14 = tpu.iota {dimensions = array<i32: 0>} : vector<64x1xi32>
    %15 = arith.sitofp %14 : vector<64x1xi32> to vector<64x1xf32>
    %cst_11 = arith.constant 5.000000e-01 : f32
    %16 = vector.broadcast %cst_11 : f32 to vector<64x1xf32>
    %17 = arith.addf %15, %16 : vector<64x1xf32>
    %cst_12 = arith.constant 1.250000e-01 : f32
    %18 = vector.broadcast %cst_12 : f32 to vector<64x1xf32>
    %19 = arith.mulf %17, %18 : vector<64x1xf32>
    %20 = math.floor %19 : vector<64x1xf32>
    %cst_13 = arith.constant 8.000000e+00 : f32
    %21 = vector.broadcast %cst_13 : f32 to vector<64x1xf32>
    %22 = arith.mulf %20, %21 : vector<64x1xf32>
    %23 = arith.subf %15, %22 : vector<64x1xf32>
    %cst_14 = arith.constant 5.000000e-01 : f32
    %24 = vector.broadcast %cst_14 : f32 to vector<64x1xf32>
    %25 = arith.cmpf ogt, %20, %24 : vector<64x1xf32>
    %cst_15 = arith.constant 1.000000e+00 : f32
    %cst_16 = arith.constant 0.000000e+00 : f32
    %26 = vector.broadcast %cst_15 : f32 to vector<64x1xf32>
    %27 = vector.broadcast %cst_16 : f32 to vector<64x1xf32>
    %28 = arith.select %25, %26, %27 : vector<64x1xi1>, vector<64x1xf32>
    %cst_17 = arith.constant 6.500000e+00 : f32
    %29 = vector.broadcast %cst_17 : f32 to vector<64x1xf32>
    %30 = arith.cmpf olt, %20, %29 : vector<64x1xf32>
    %cst_18 = arith.constant 1.000000e+00 : f32
    %cst_19 = arith.constant 0.000000e+00 : f32
    %31 = vector.broadcast %cst_18 : f32 to vector<64x1xf32>
    %32 = vector.broadcast %cst_19 : f32 to vector<64x1xf32>
    %33 = arith.select %30, %31, %32 : vector<64x1xi1>, vector<64x1xf32>
    %cst_20 = arith.constant 5.000000e-01 : f32
    %34 = vector.broadcast %cst_20 : f32 to vector<64x1xf32>
    %35 = arith.cmpf ogt, %23, %34 : vector<64x1xf32>
    %cst_21 = arith.constant 1.000000e+00 : f32
    %cst_22 = arith.constant 0.000000e+00 : f32
    %36 = vector.broadcast %cst_21 : f32 to vector<64x1xf32>
    %37 = vector.broadcast %cst_22 : f32 to vector<64x1xf32>
    %38 = arith.select %35, %36, %37 : vector<64x1xi1>, vector<64x1xf32>
    %cst_23 = arith.constant 6.500000e+00 : f32
    %39 = vector.broadcast %cst_23 : f32 to vector<64x1xf32>
    %40 = arith.cmpf olt, %23, %39 : vector<64x1xf32>
    %cst_24 = arith.constant 1.000000e+00 : f32
    %cst_25 = arith.constant 0.000000e+00 : f32
    %41 = vector.broadcast %cst_24 : f32 to vector<64x1xf32>
    %42 = vector.broadcast %cst_25 : f32 to vector<64x1xf32>
    %43 = arith.select %40, %41, %42 : vector<64x1xi1>, vector<64x1xf32>
    %44 = arith.mulf %28, %38 : vector<64x1xf32>
    %c9_i32 = arith.constant 9 : i32
    %45 = tpu.dynamic_rotate %12 by %c9_i32 dim 0 : vector<64x128xf32>, i32 -> vector<64x128xf32>
    %46 = vector.broadcast %44 : vector<64x1xf32> to vector<64x128xf32>
    %47 = arith.mulf %45, %46 : vector<64x128xf32>
    %48 = arith.truncf %47 : vector<64x128xf32> to vector<64x128xbf16>
    %c0_26 = arith.constant 0 : index
    %c0_27 = arith.constant 0 : index
    %49 = vector.load %arg10[%c0_26, %c0_27] : memref<64x1152xbf16, #tpu.memory_space<vmem>>, vector<64x128xbf16>
    tpu.vector_store %arg10[%c0_26, %c0_27], %48 {strides = array<i32>} : memref<64x1152xbf16, #tpu.memory_space<vmem>>, vector<64x128xbf16>,
    %c8_i32 = arith.constant 8 : i32
    %50 = tpu.dynamic_rotate %12 by %c8_i32 dim 0 : vector<64x128xf32>, i32 -> vector<64x128xf32>
    %51 = vector.broadcast %28 : vector<64x1xf32> to vector<64x128xf32>
    %52 = arith.mulf %50, %51 : vector<64x128xf32>
    %53 = arith.truncf %52 : vector<64x128xf32> to vector<64x128xbf16>
    %c0_28 = arith.constant 0 : index
    %c128 = arith.constant 128 : index
    %54 = vector.load %arg10[%c0_28, %c128] : memref<64x1152xbf16, #tpu.memory_space<vmem>>, vector<64x128xbf16>
    tpu.vector_store %arg10[%c0_28, %c128], %53 {strides = array<i32>} : memref<64x1152xbf16, #tpu.memory_space<vmem>>, vector<64x128xbf16>,
    %55 = arith.mulf %28, %43 : vector<64x1xf32>
    %c7_i32 = arith.constant 7 : i32
    %56 = tpu.dynamic_rotate %12 by %c7_i32 dim 0 : vector<64x128xf32>, i32 -> vector<64x128xf32>
    %57 = vector.broadcast %55 : vector<64x1xf32> to vector<64x128xf32>
    %58 = arith.mulf %56, %57 : vector<64x128xf32>
    %59 = arith.truncf %58 : vector<64x128xf32> to vector<64x128xbf16>
    %c0_29 = arith.constant 0 : index
    %c256 = arith.constant 256 : index
    %60 = vector.load %arg10[%c0_29, %c256] : memref<64x1152xbf16, #tpu.memory_space<vmem>>, vector<64x128xbf16>
    tpu.vector_store %arg10[%c0_29, %c256], %59 {strides = array<i32>} : memref<64x1152xbf16, #tpu.memory_space<vmem>>, vector<64x128xbf16>,
    %c1_i32 = arith.constant 1 : i32
    %61 = tpu.dynamic_rotate %12 by %c1_i32 dim 0 : vector<64x128xf32>, i32 -> vector<64x128xf32>
    %62 = vector.broadcast %38 : vector<64x1xf32> to vector<64x128xf32>
    %63 = arith.mulf %61, %62 : vector<64x128xf32>
    %64 = arith.truncf %63 : vector<64x128xf32> to vector<64x128xbf16>
    %c0_30 = arith.constant 0 : index
    %c384 = arith.constant 384 : index
    %65 = vector.load %arg10[%c0_30, %c384] : memref<64x1152xbf16, #tpu.memory_space<vmem>>, vector<64x128xbf16>
    tpu.vector_store %arg10[%c0_30, %c384], %64 {strides = array<i32>} : memref<64x1152xbf16, #tpu.memory_space<vmem>>, vector<64x128xbf16>,
    %c0_31 = arith.constant 0 : index
    %c512 = arith.constant 512 : index
    %66 = vector.load %arg10[%c0_31, %c512] : memref<64x1152xbf16, #tpu.memory_space<vmem>>, vector<64x128xbf16>
    tpu.vector_store %arg10[%c0_31, %c512], %13 {strides = array<i32>} : memref<64x1152xbf16, #tpu.memory_space<vmem>>, vector<64x128xbf16>,
    %c63_i32 = arith.constant 63 : i32
    %67 = tpu.dynamic_rotate %12 by %c63_i32 dim 0 : vector<64x128xf32>, i32 -> vector<64x128xf32>
    %68 = vector.broadcast %43 : vector<64x1xf32> to vector<64x128xf32>
    %69 = arith.mulf %67, %68 : vector<64x128xf32>
    %70 = arith.truncf %69 : vector<64x128xf32> to vector<64x128xbf16>
    %c0_32 = arith.constant 0 : index
    %c640 = arith.constant 640 : index
    %71 = vector.load %arg10[%c0_32, %c640] : memref<64x1152xbf16, #tpu.memory_space<vmem>>, vector<64x128xbf16>
    tpu.vector_store %arg10[%c0_32, %c640], %70 {strides = array<i32>} : memref<64x1152xbf16, #tpu.memory_space<vmem>>, vector<64x128xbf16>,
    %72 = arith.mulf %33, %38 : vector<64x1xf32>
    %c57_i32 = arith.constant 57 : i32
    %73 = tpu.dynamic_rotate %12 by %c57_i32 dim 0 : vector<64x128xf32>, i32 -> vector<64x128xf32>
    %74 = vector.broadcast %72 : vector<64x1xf32> to vector<64x128xf32>
    %75 = arith.mulf %73, %74 : vector<64x128xf32>
    %76 = arith.truncf %75 : vector<64x128xf32> to vector<64x128xbf16>
    %c0_33 = arith.constant 0 : index
    %c768 = arith.constant 768 : index
    %77 = vector.load %arg10[%c0_33, %c768] : memref<64x1152xbf16, #tpu.memory_space<vmem>>, vector<64x128xbf16>
    tpu.vector_store %arg10[%c0_33, %c768], %76 {strides = array<i32>} : memref<64x1152xbf16, #tpu.memory_space<vmem>>, vector<64x128xbf16>,
    %c56_i32 = arith.constant 56 : i32
    %78 = tpu.dynamic_rotate %12 by %c56_i32 dim 0 : vector<64x128xf32>, i32 -> vector<64x128xf32>
    %79 = vector.broadcast %33 : vector<64x1xf32> to vector<64x128xf32>
    %80 = arith.mulf %78, %79 : vector<64x128xf32>
    %81 = arith.truncf %80 : vector<64x128xf32> to vector<64x128xbf16>
    %c0_34 = arith.constant 0 : index
    %c896 = arith.constant 896 : index
    %82 = vector.load %arg10[%c0_34, %c896] : memref<64x1152xbf16, #tpu.memory_space<vmem>>, vector<64x128xbf16>
    tpu.vector_store %arg10[%c0_34, %c896], %81 {strides = array<i32>} : memref<64x1152xbf16, #tpu.memory_space<vmem>>, vector<64x128xbf16>,
    %83 = arith.mulf %33, %43 : vector<64x1xf32>
    %c55_i32 = arith.constant 55 : i32
    %84 = tpu.dynamic_rotate %12 by %c55_i32 dim 0 : vector<64x128xf32>, i32 -> vector<64x128xf32>
    %85 = vector.broadcast %83 : vector<64x1xf32> to vector<64x128xf32>
    %86 = arith.mulf %84, %85 : vector<64x128xf32>
    %87 = arith.truncf %86 : vector<64x128xf32> to vector<64x128xbf16>
    %c0_35 = arith.constant 0 : index
    %c1024 = arith.constant 1024 : index
    %88 = vector.load %arg10[%c0_35, %c1024] : memref<64x1152xbf16, #tpu.memory_space<vmem>>, vector<64x128xbf16>
    tpu.vector_store %arg10[%c0_35, %c1024], %87 {strides = array<i32>} : memref<64x1152xbf16, #tpu.memory_space<vmem>>, vector<64x128xbf16>,
    %c0_36 = arith.constant 0 : index
    %c0_37 = arith.constant 0 : index
    %89 = vector.load %arg10[%c0_36, %c0_37] : memref<64x1152xbf16, #tpu.memory_space<vmem>>, vector<64x1152xbf16>
    %c0_38 = arith.constant 0 : index
    %c0_39 = arith.constant 0 : index
    %90 = vector.load %arg3[%c0_38, %c0_39] : memref<1152x128xbf16, #tpu.memory_space<vmem>>, vector<1152x128xbf16>
    %cst_40 = arith.constant dense<0.000000e+00> : vector<64x128xf32>
    %91 = tpu.matmul %89, %90, %cst_40 {dimension_numbers = #tpu.dot_dimension_numbers<[1], [0], [0], [1], [0, 0, 1, 1], [], []>} : vector<64x1152xbf16>, vector<1152x128xbf16>, vector<64x128xf32> -> vector<64x128xf32>
    %92 = vector.broadcast %3 : vector<1x128xf32> to vector<64x128xf32>
    %93 = arith.addf %91, %92 : vector<64x128xf32>
    %cst_41 = arith.constant 0.000000e+00 : f32
    %94 = vector.broadcast %cst_41 : f32 to vector<64x128xf32>
    %95 = arith.maximumf %93, %94 : vector<64x128xf32>
    %96 = arith.truncf %95 : vector<64x128xf32> to vector<64x128xbf16>
    %c0_42 = arith.constant 0 : index
    %c0_43 = arith.constant 0 : index
    %97 = vector.load %arg4[%c0_42, %c0_43] : memref<128x128xbf16, #tpu.memory_space<vmem>>, vector<128x128xbf16>
    %cst_44 = arith.constant dense<0.000000e+00> : vector<64x128xf32>
    %98 = tpu.matmul %96, %97, %cst_44 {dimension_numbers = #tpu.dot_dimension_numbers<[1], [0], [0], [1], [0, 0, 1, 1], [], []>} : vector<64x128xbf16>, vector<128x128xbf16>, vector<64x128xf32> -> vector<64x128xf32>
    %99 = vector.broadcast %4 : vector<1x128xf32> to vector<64x128xf32>
    %100 = arith.addf %98, %99 : vector<64x128xf32>
    %cst_45 = arith.constant dense<0.000000e+00> : vector<128xf32>
    %101 = vector.multi_reduction <add>, %100, %cst_45 [0] : vector<64x128xf32> to vector<128xf32>
    %102 = vector.shape_cast %101 : vector<128xf32> to vector<1x128xf32>
    %cst_46 = arith.constant 6.400000e+01 : f32
    %103 = vector.broadcast %cst_46 : f32 to vector<1x128xf32>
    %104 = arith.divf %102, %103 : vector<1x128xf32>
    %c0_47 = arith.constant 0 : index
    %c0_48 = arith.constant 0 : index
    %105 = vector.load %arg5[%c0_47, %c0_48] : memref<16x128xf32, #tpu.memory_space<vmem>>, vector<16x128xf32>
    %106 = vector.broadcast %104 : vector<1x128xf32> to vector<16x128xf32>
    %107 = arith.mulf %105, %106 : vector<16x128xf32>
    %cst_49 = arith.constant dense<0.000000e+00> : vector<16xf32>
    %108 = vector.multi_reduction <add>, %107, %cst_49 [1] : vector<16x128xf32> to vector<16xf32>
    %109 = vector.shape_cast %108 : vector<16xf32> to vector<16x1xf32>
    %c0_50 = arith.constant 0 : index
    %c0_51 = arith.constant 0 : index
    %110 = vector.load %arg6[%c0_50, %c0_51] : memref<16x1xf32, #tpu.memory_space<vmem>>, vector<16x1xf32>
    %111 = arith.addf %109, %110 : vector<16x1xf32>
    %cst_52 = arith.constant 0.000000e+00 : f32
    %112 = vector.broadcast %cst_52 : f32 to vector<16x1xf32>
    %113 = arith.cmpf ogt, %111, %112 : vector<16x1xf32>
    %114 = vector.broadcast %6 : vector<1x1xf32> to vector<16x1xf32>
    %115 = arith.mulf %114, %111 : vector<16x1xf32>
    %116 = arith.select %113, %111, %115 : vector<16x1xi1>, vector<16x1xf32>
    %c0_53 = arith.constant 0 : index
    %c0_54 = arith.constant 0 : index
    %117 = vector.load %arg7[%c0_53, %c0_54] : memref<16x128xf32, #tpu.memory_space<vmem>>, vector<16x128xf32>
    %118 = vector.broadcast %116 : vector<16x1xf32> to vector<16x128xf32>
    %119 = arith.mulf %117, %118 : vector<16x128xf32>
    %cst_55 = arith.constant dense<0.000000e+00> : vector<128xf32>
    %120 = vector.multi_reduction <add>, %119, %cst_55 [0] : vector<16x128xf32> to vector<128xf32>
    %121 = vector.shape_cast %120 : vector<128xf32> to vector<1x128xf32>
    %122 = arith.addf %121, %5 : vector<1x128xf32>
    %123 = arith.negf %122 : vector<1x128xf32>
    %124 = math.exp %123 : vector<1x128xf32>
    %cst_56 = arith.constant 1.000000e+00 : f32
    %125 = vector.broadcast %cst_56 : f32 to vector<1x128xf32>
    %126 = arith.addf %125, %124 : vector<1x128xf32>
    %127 = arith.divf %125, %126 : vector<1x128xf32>
    %128 = vector.broadcast %127 : vector<1x128xf32> to vector<64x128xf32>
    %129 = arith.mulf %100, %128 : vector<64x128xf32>
    %130 = arith.extf %1 : vector<64x128xbf16> to vector<64x128xf32>
    %131 = arith.addf %129, %130 : vector<64x128xf32>
    %cst_57 = arith.constant 0.000000e+00 : f32
    %132 = vector.broadcast %cst_57 : f32 to vector<64x128xf32>
    %133 = arith.maximumf %131, %132 : vector<64x128xf32>
    %134 = arith.truncf %133 : vector<64x128xf32> to vector<64x128xbf16>
    %c0_58 = arith.constant 0 : index
    %c0_59 = arith.constant 0 : index
    %c0_60 = arith.constant 0 : index
    %135 = vector.load %arg9[%c0_58, %c0_59, %c0_60] : memref<1x64x128xbf16, #tpu.memory_space<vmem>>, vector<1x64x128xbf16>
    %136 = vector.shape_cast %135 : vector<1x64x128xbf16> to vector<64x128xbf16>
    %137 = vector.shape_cast %134 : vector<64x128xbf16> to vector<1x64x128xbf16>
    tpu.vector_store %arg9[%c0_58, %c0_59, %c0_60], %137 {strides = array<i32>} : memref<1x64x128xbf16, #tpu.memory_space<vmem>>, vector<1x64x128xbf16>,
    return
  }
  func.func @transform_0(%arg0: i32) -> (i32, i32, i32) {
    %c0_i32 = arith.constant 0 : i32
    %c0_i32_0 = arith.constant 0 : i32
    %c0_i32_1 = arith.constant 0 : i32
    return %arg0, %c0_i32, %c0_i32_0 : i32, i32, i32
  }
  func.func @transform_1(%arg0: i32) -> (i32, i32) {
    %c0_i32 = arith.constant 0 : i32
    %c0_i32_0 = arith.constant 0 : i32
    %c0_i32_1 = arith.constant 0 : i32
    return %c0_i32, %c0_i32_0 : i32, i32
  }
  func.func @transform_2(%arg0: i32) -> (i32, i32) {
    %c0_i32 = arith.constant 0 : i32
    %c0_i32_0 = arith.constant 0 : i32
    %c0_i32_1 = arith.constant 0 : i32
    return %c0_i32, %c0_i32_0 : i32, i32
  }
  func.func @transform_3(%arg0: i32) -> (i32, i32) {
    %c0_i32 = arith.constant 0 : i32
    %c0_i32_0 = arith.constant 0 : i32
    %c0_i32_1 = arith.constant 0 : i32
    return %c0_i32, %c0_i32_0 : i32, i32
  }
  func.func @transform_4(%arg0: i32) -> (i32, i32) {
    %c0_i32 = arith.constant 0 : i32
    %c0_i32_0 = arith.constant 0 : i32
    %c0_i32_1 = arith.constant 0 : i32
    return %c0_i32, %c0_i32_0 : i32, i32
  }
  func.func @transform_5(%arg0: i32) -> (i32, i32) {
    %c0_i32 = arith.constant 0 : i32
    %c0_i32_0 = arith.constant 0 : i32
    %c0_i32_1 = arith.constant 0 : i32
    return %c0_i32, %c0_i32_0 : i32, i32
  }
  func.func @transform_6(%arg0: i32) -> (i32, i32) {
    %c0_i32 = arith.constant 0 : i32
    %c0_i32_0 = arith.constant 0 : i32
    %c0_i32_1 = arith.constant 0 : i32
    return %c0_i32, %c0_i32_0 : i32, i32
  }
  func.func @transform_7(%arg0: i32) -> (i32, i32) {
    %c0_i32 = arith.constant 0 : i32
    %c0_i32_0 = arith.constant 0 : i32
    %c0_i32_1 = arith.constant 0 : i32
    return %c0_i32, %c0_i32_0 : i32, i32
  }
  func.func @transform_8(%arg0: i32) -> (i32, i32, i32) {
    %c0_i32 = arith.constant 0 : i32
    %c0_i32_0 = arith.constant 0 : i32
    %c0_i32_1 = arith.constant 0 : i32
    return %arg0, %c0_i32, %c0_i32_0 : i32, i32, i32
  }
}

</mosaic_0001>

<bundles_post_ra>
// kernel: se_bottleneck_forward.1
= control target key start
LH: loop header
LB: loop body
LE: loop exit
PB: predicated region body
PF: predicated region fallthrough
CT: control target
= control target key end

     0   :  { %13 = vsyncpa [#allocation4], 0  ;;  %s2771_s27 = smov 0   ;;  %s3734_s0 = inlined_call_operand.vmem [shape: bf16[2,64,128], index: 0, kind: input, shape index: {}]   ;;  %s3735_s1 = inlined_call_operand.vmem [shape: bf16[128,128], index: 1, kind: input, shape index: {}]   ;;  %s3736_s2 = inlined_call_operand.hbm [shape: bf16[1152,128], index: 2, kind: input, shape index: {}]   ;;  %s3737_s3 = inlined_call_operand.vmem [shape: bf16[128,128], index: 3, kind: input, shape index: {}]   ;;  %s3738_s4 = inlined_call_operand.vmem [shape: f32[16,128], index: 4, kind: input, shape index: {}]   ;;  %s3739_s5 = inlined_call_operand.vmem [shape: f32[16,1], index: 5, kind: input, shape index: {}]   ;;  %s3740_s6 = inlined_call_operand.vmem [shape: f32[16,128], index: 6, kind: input, shape index: {}]   ;;  %s3741_s7 = inlined_call_operand.vmem [shape: f32[8,128], index: 7, kind: input, shape index: {}]   ;;  %s3742_s8 = inlined_call_operand.vmem [shape: bf16[2,64,128], index: 8, kind: output, shape index: {}]  }
   0x1 LB: > { %s2777_s28 = sadd.s32 4294967295, %s2719_s27   ;;  %p2119_p0 = scmp.ge.s32.totalorder %s2719_s27, 1  ;;  %s2719_s27 = sphi %s2771_s27, %s19_s27  }
   0x2   : > { %p223_p1 = scmp.lt.s32.totalorder %s2719_s27, 3  ;;  %s2721_s29 = smov [#allocation3]  }
   0x3   : > { %s238_s30 = sshll.u32 %s2721_s29, 4  ;;  %p3743_p3 = scmp.eq.s32.totalorder %s2777_s28, 0  ;;  %s239_s30 = int_to_ptr.vmem [resolvable:$true] %s238_s30 }
   0x4   : > { %p2781_p2 = pnand %p2119_p0, %p223_p1  ;;  %s2681_s13 = scalar_lea.hbm %s3736_s2, 9216 }
   0x5   : > { %p2682_p6 = scmp.ne.s32.totalorder %s3736_s2, %s2681_s13  ;;  %p2688_p10 = scmp.lt.u32.totalorder %s2681_s13, %s3736_s2 }
   0x6   : > { %s3762_s9 = scalar_select %p2781_p2, 1, 0 }
   0x7   : > { %p2556_p4 = pneg %p2781_p2 }
   0x9   : > { %p2790_p5 = pnand %p3743_p3, %p2556_p4 }
   0xb   : > { %p2683_p7 = pneg %p2790_p5 }
   0xd   : > { %p2684_p8 = pnand %p2683_p7, %p2682_p6 }
   0xf   : > { %p2685_p9 = pneg %p2684_p8 }
  0x11   : > { %p2690_p11 = pnand %p2688_p10, %p2685_p9 }
  0x13   : > { %2693 = shalt.err (!%p2690_p11)
}
  0x14   : > { %s2694_s18 = scalar_lea.vmem %s239_s30, 9216  ;;  %p2702_p1 = scmp.lt.s32.totalorder %s239_s30, %s239_s30 }
  0x15   : > { %p2695_p12 = scmp.ne.s32.totalorder %s239_s30, %s2694_s18  ;;  %p2703_p4 = scmp.lt.s32.totalorder %s2694_s18, %s2694_s18 }
  0x17   : > { %p2697_p13 = pnand %p2695_p12, %p2683_p7  ;;  %p2704_p3 = por %p2703_p4, %p2702_p1 }
  0x19   : > { %p2698_p0 = pneg %p2697_p13 }
  0x1b   : > { %p2705_p2 = pnand %p2704_p3, %p2698_p0 }
  0x1d   : > { %2708 = shalt.err (!%p2705_p2)
}
  0x1e   : > { %s2722_s19 = smov 64   ;;  %s2723_s20 = smov 4  }
  0x1f   : > { %2559 = dma.hbm_to_vmem [thread:$0]  (!%p2790_p5), %s3736_s2, 9216, %s239_s30, [#allocation4], %s2722_s19, %s2722_s19, %s2723_s20  }
  0x20   : > { %p3764_p6 = scmp.ne.s32.totalorder %s3762_s9, 0 }
  0x22   : > { %277 = sbr.rel (%p3764_p6) target bundleno = 1179 (0x49b), region = 52 }
  0x29   : > { %p3765_p8 = scmp.eq.s32.totalorder %s2777_s28, 0 }
  0x2b   : > { %2714 = dma.done.wait (%p3765_p8), [#allocation4], 9216   ;;  %p3766_p7 = pmov %p3765_p8 }
  0x2c   : > { %p311_p2 = scmp.lt.s32.totalorder %s2777_s28, 1  ;;  %v2577_v0 = vld [vmem:[%s3735_s1] sm:$0xff]   ;;  %v2578_v1 = vld [vmem:[%s3735_s1 + $0x8] sm:$0xff]   ;;  %v2579_v2 = vld [vmem:[%s3735_s1 + $0x10] sm:$0xff]   ;;  %v504_v46 = vlaneseq }
  0x2d   : > { %2716 = vsyncadd (%p3766_p7), [#allocation4], 4294958080  ;;  %2464 = vmatprep.subr.bf16.mxu0 %v2577_v0  ;;  %v2580_v3 = vld [vmem:[%s3735_s1 + $0x18] sm:$0xff]   ;;  %v2589_v5 = vld [vmem:[#allocation3 + $0x40] sm:$0xff]  }
  0x2e   : > { %s3851_s28 = smov (!%p311_p2, %s2777_s28), 1  ;;  %2465 = vmatpush3.bf16.msra.mxu0 %v2577_v0  ;;  %v2590_v6 = vld [vmem:[#allocation3] sm:$0xff]   ;;  %2280 = vmatprep.subr.bf16.mxu1 %v2589_v5  ;;  %v2593_v8 = vld [vmem:[#allocation3 + $0x48] sm:$0xff]   ;;  %v2597_v11 = vld [vmem:[#allocation3 + $0x50] sm:$0xff]   ;;  %v2856_v47 = vshrl.u32 %v504_v46, 7 }
  0x2f   : > { %s2235_s29 = sshll.u32 %s3851_s28, 5  ;;  %2466 = vmatprep.subr.bf16.mxu0 %v2578_v1  ;;  %v2581_v7 = vld [vmem:[%s3735_s1 + $0x20] sm:$0xff]   ;;  %2281 = vmatpush3.bf16.msra.mxu1 %v2590_v6  ;;  %v2594_v9 = vld [vmem:[#allocation3 + $0x8] sm:$0xff]   ;;  %v2598_v12 = vld [vmem:[#allocation3 + $0x10] sm:$0xff]  }
  0x30   : > { %s2835_s12 = scalar_lea.vmem %s3734_s0, %s2235_s29  ;;  %v2582_v10 = vld [vmem:[%s3735_s1 + $0x28] sm:$0xff]   ;;  %2282 = vmatprep.subr.bf16.mxu1 %v2593_v8  ;;  %v2583_v13 = vld [vmem:[%s3735_s1 + $0x30] sm:$0xff]   ;;  %v2584_v14 = vld [vmem:[%s3735_s1 + $0x38] sm:$0xff]   ;;  %v506_v48 = vadd.s32 8, %v2856_v47  ;;  %v507_v49 = vadd.s32 16, %v2856_v47  ;;  %v508_v50 = vadd.s32 24, %v2856_v47  ;;  %v513_v52 = vcvt.s32.f32 %v2856_v47  ;;  %s320_s26 = scalar_lea.vmem %s3742_s8, %s2235_s29 }
  0x31   : > { %v322_v4 = vld [vmem:[%s2835_s12] sm:$0xff]   ;;  %v324_v15 = vld [vmem:[%s2835_s12 + $0x8] sm:$0xff]   ;;  %v326_v16 = vld [vmem:[%s2835_s12 + $0x10] sm:$0xff]   ;;  %v509_v56 = vadd.s32 32, %v2856_v47  ;;  %v510_v57 = vadd.s32 40, %v2856_v47  ;;  %v2870_v6 = vadd.s32 56, %v2856_v47 }
  0x32   : > { %2467 = vmatpush3.bf16.msra.mxu0 %v2578_v1  ;;  %2480 = vmatprep.mubr.bf16.mxu0 %v322_v4  ;;  %v2591_v17 = vld [vmem:[#allocation3 + $0xc0] sm:$0xff]   ;;  %v2595_v19 = vld [vmem:[#allocation3 + $0xc8] sm:$0xff]   ;;  %v328_v20 = vld [vmem:[%s2835_s12 + $0x18] sm:$0xff]   ;;  %v514_v51 = vcvt.s32.f32 %v506_v48  ;;  %v515_v53 = vcvt.s32.f32 %v507_v49  ;;  %v516_v54 = vcvt.s32.f32 %v508_v50  ;;  %v521_v58 = vadd.f32 0.5, %v513_v52 }
  0x33   : > { %2468 = vmatprep.subr.bf16.mxu0 %v2579_v2  ;;  %2283 = vmatpush3.bf16.msra.mxu1 %v2594_v9  ;;  %v2592_v18 = vld [vmem:[#allocation3 + $0x80] sm:$0xff]   ;;  %v2596_v21 = vld [vmem:[#allocation3 + $0x88] sm:$0xff]   ;;  %v2599_v22 = vld [vmem:[#allocation3 + $0xd0] sm:$0xff]   ;;  %v517_v62 = vcvt.s32.f32 %v509_v56  ;;  %v518_v63 = vcvt.s32.f32 %v510_v57 }
  0x34   : > { %2284 = vmatprep.subr.bf16.mxu1 %v2597_v11  ;;  %v2600_v23 = vld [vmem:[#allocation3 + $0x90] sm:$0xff]   ;;  %v2601_v24 = vld [vmem:[#allocation3 + $0x58] sm:$0xff]   ;;  %v2605_v28 = vld [vmem:[#allocation3 + $0x60] sm:$0xff]   ;;  %v522_v55 = vadd.f32 0.5, %v514_v51  ;;  %v523_v59 = vadd.f32 0.5, %v515_v53  ;;  %v524_v60 = vadd.f32 0.5, %v516_v54 }
  0x35   : > { %v2602_v25 = vld [vmem:[#allocation3 + $0x18] sm:$0xff]   ;;  %v2606_v29 = vld [vmem:[#allocation3 + $0x20] sm:$0xff]   ;;  %v2609_v32 = vld [vmem:[#allocation3 + $0x68] sm:$0xff]   ;;  %v529_v0 = vmul.f32 0.125, %v521_v58  ;;  %v525_v5 = vadd.f32 0.5, %v517_v62 }
  0x36   : > { %2469 = vmatpush3.bf16.msra.mxu0 %v2579_v2  ;;  %v2603_v26 = vld [vmem:[#allocation3 + $0xd8] sm:$0xff]   ;;  %v2607_v30 = vld [vmem:[#allocation3 + $0xe0] sm:$0xff]   ;;  %v2610_v33 = vld [vmem:[#allocation3 + $0x28] sm:$0xff]   ;;  %v530_v61 = vmul.f32 0.125, %v522_v55  ;;  %v531_v1 = vmul.f32 0.125, %v523_v59  ;;  %v532_v2 = vmul.f32 0.125, %v524_v60 }
  0x37   : > { %2470 = vmatprep.subr.bf16.mxu0 %v2580_v3  ;;  %2285 = vmatpush3.bf16.msra.mxu1 %v2598_v12  ;;  %v2604_v27 = vld [vmem:[#allocation3 + $0x98] sm:$0xff]   ;;  %v2608_v31 = vld [vmem:[#allocation3 + $0xa0] sm:$0xff]   ;;  %v2611_v34 = vld [vmem:[#allocation3 + $0xe8] sm:$0xff]   ;;  %v2872_v8 = vfloor.f32 %v529_v0 }
  0x38   : > { %2286 = vmatprep.subr.bf16.mxu1 %v2601_v24  ;;  %v2612_v35 = vld [vmem:[#allocation3 + $0xa8] sm:$0xff]   ;;  %v2613_v36 = vld [vmem:[#allocation3 + $0x70] sm:$0xff]   ;;  %v2617_v40 = vld [vmem:[#allocation3 + $0x78] sm:$0xff]   ;;  %v2867_v4 = vfloor.f32 %v530_v61  ;;  %v2874_v9 = vfloor.f32 %v531_v1 }
  0x39   : > { %v2614_v37 = vld [vmem:[#allocation3 + $0x30] sm:$0xff]   ;;  %v2618_v41 = vld [vmem:[#allocation3 + $0x38] sm:$0xff]   ;;  %v2621_v44 = vld [vmem:[#allocation3 + $0x140] sm:$0xff]   ;;  %vm561_vm10 = vcmp.gt.f32.partialorder %v2872_v8, 0.5 }
  0x3a   : > { %2471 = vmatpush3.bf16.msra.mxu0 %v2580_v3  ;;  %v2615_v38 = vld [vmem:[#allocation3 + $0xf0] sm:$0xff]   ;;  %v2619_v42 = vld [vmem:[#allocation3 + $0xf8] sm:$0xff]   ;;  %v2623_v45 = vld [vmem:[#allocation3 + $0x1c0] sm:$0xff]   ;;  %v2865_v3 = vadd.s32 48, %v2856_v47  ;;  %v546_v12 = vmul.f32 8.0, %v2867_v4  ;;  %vm562_vm0 = vcmp.gt.f32.partialorder %v2867_v4, 0.5 }
  0x3b   : > { %2472 = vmatprep.subr.bf16.mxu0 %v2581_v7  ;;  %2287 = vmatpush3.bf16.msra.mxu1 %v2602_v25  ;;  %v2616_v39 = vld [vmem:[#allocation3 + $0xb0] sm:$0xff]   ;;  %v2620_v43 = vld [vmem:[#allocation3 + $0xb8] sm:$0xff]   ;;  %vm563_vm3 = vcmp.gt.f32.partialorder %v2874_v9, 0.5 }
  0x3c   : > { %2288 = vmatprep.subr.bf16.mxu1 %v2605_v28  ;;  %v519_v11 = vcvt.s32.f32 %v2865_v3 }
  0x3e   : > { %2473 = vmatpush3.bf16.msra.mxu0 %v2581_v7  ;;  %v526_v7 = vadd.f32 0.5, %v518_v63 }
  0x3f   : > { %2474 = vmatprep.subr.bf16.mxu0 %v2582_v10  ;;  %2289 = vmatpush3.bf16.msra.mxu1 %v2606_v29 }
  0x40   : > { %2290 = vmatprep.subr.bf16.mxu1 %v2609_v32 }
  0x42   : > { %2475 = vmatpush3.bf16.msra.mxu0 %v2582_v10  ;;  %v2876_v10 = vfloor.f32 %v532_v2 }
  0x43   : > { %2476 = vmatprep.subr.bf16.mxu0 %v2583_v13  ;;  %2291 = vmatpush3.bf16.msra.mxu1 %v2610_v33 }
  0x44   : > { %2292 = vmatprep.subr.bf16.mxu1 %v2613_v36  ;;  %vm564_vm1 = vcmp.gt.f32.partialorder %v2876_v10, 0.5 }
  0x46   : > { %2477 = vmatpush3.bf16.msra.mxu0 %v2583_v13  ;;  %v533_v13 = vmul.f32 0.125, %v525_v5 }
  0x47   : > { %2478 = vmatprep.subr.bf16.mxu0 %v2584_v14  ;;  %2293 = vmatpush3.bf16.msra.mxu1 %v2614_v37 }
  0x48   : > { %2294 = vmatprep.subr.bf16.mxu1 %v2617_v40 }
  0x4a   : > { %2479 = vmatpush3.bf16.msra.mxu0 %v2584_v14  ;;  %v520_v14 = vcvt.s32.f32 %v2870_v6 }
  0x4b   : > { %2320 = vmatprep.subr.bf16.mxu0 %v2591_v17  ;;  %2295 = vmatpush3.bf16.msra.mxu1 %v2618_v41  ;;  %v547_v17 = vmul.f32 8.0, %v2874_v9 }
  0x4c   : > { %2360 = vmatprep.subr.bf16.mxu1 %v2621_v44 }
  0x4d   : > { %2481 = vmatmul.mubr.bf16.vlgmr.msra.gmra.mrb[0].mxu0 %v324_v15  ;;  %v534_v15 = vmul.f32 0.125, %v526_v7  ;;  %v555_v25 = vsub.f32 %v515_v53, %v547_v17 }
  0x4e   : > { %2484 = vmatprep.mubr.bf16.mxu0 %v326_v16  ;;  %2321 = vmatpush3.bf16.msra.mxu0 %v2592_v18  ;;  %v545_v16 = vmul.f32 8.0, %v2872_v8  ;;  %v548_v18 = vmul.f32 8.0, %v2876_v10 }
  0x4f   : > { %2322 = vmatprep.subr.bf16.mxu0 %v2595_v19  ;;  %v527_v19 = vadd.f32 0.5, %v519_v11  ;;  %vm595_vm7 = vcmp.gt.f32.partialorder %v555_v25, 0.5  ;;  %vm611_vm9 = vcmp.lt.f32.partialorder %v555_v25, 6.5 }
  0x50   : > { %v553_v24 = vsub.f32 %v513_v52, %v545_v16 }
  0x52   : > { %2323 = vmatpush3.bf16.msra.mxu0 %v2596_v21  ;;  %v2886_v21 = vfloor.f32 %v533_v13  ;;  %vm593_vm4 = vcmp.gt.f32.partialorder %v553_v24, 0.5  ;;  %vm609_vm6 = vcmp.lt.f32.partialorder %v553_v24, 6.5 }
  0x53   : > { %2324 = vmatprep.subr.bf16.mxu0 %v2599_v22  ;;  %v528_v22 = vadd.f32 0.5, %v520_v14 }
  0x54   : > { %v549_v28 = vmul.f32 8.0, %v2886_v21  ;;  %vm565_vm12 = vcmp.gt.f32.partialorder %v2886_v21, 0.5 }
  0x55   : > { %2485 = vmatmul.mubr.bf16.gmra.mrb[4].mxu0 %v328_v20  ;;  %v554_v20 = vsub.f32 %v514_v51, %v546_v12  ;;  %v536_v29 = vmul.f32 0.125, %v528_v22 }
  0x56   : > { %2325 = vmatpush3.bf16.msra.mxu0 %v2600_v23  ;;  %v2890_v23 = vfloor.f32 %v534_v15  ;;  %v557_v36 = vsub.f32 %v517_v62, %v549_v28 }
  0x57   : > { %2326 = vmatprep.subr.bf16.mxu0 %v2603_v26  ;;  %v556_v26 = vsub.f32 %v516_v54, %v548_v18  ;;  %vm610_vm2 = vcmp.lt.f32.partialorder %v554_v20, 6.5  ;;  %vm594_vm5 = vcmp.gt.f32.partialorder %v554_v20, 0.5  ;;  %v2909_v37 = vfloor.f32 %v536_v29 }
  0x58   : > { %v550_v33 = vmul.f32 8.0, %v2890_v23  ;;  %vm597_vm13 = vcmp.gt.f32.partialorder %v557_v36, 0.5  ;;  %vm566_vm14 = vcmp.gt.f32.partialorder %v2890_v23, 0.5 }
  0x59   : > { %vm596_vm8 = vcmp.gt.f32.partialorder %v556_v26, 0.5  ;;  %vm612_vm11 = vcmp.lt.f32.partialorder %v556_v26, 6.5  ;;  %v552_v52 = vmul.f32 8.0, %v2909_v37 }
  0x5a   : > { %2327 = vmatpush3.bf16.msra.mxu0 %v2604_v27  ;;  %v535_v27 = vmul.f32 0.125, %v527_v19  ;;  %v558_v41 = vsub.f32 %v518_v63, %v550_v33 }
  0x5b   : > { %2328 = vmatprep.subr.bf16.mxu0 %v2607_v30  ;;  %v2724_v30 = vmov 0.0   ;;  %v560_v63 = vsub.f32 %v520_v14, %v552_v52 }
  0x5c   : > { %v2900_v32 = vsel %vm564_vm1, 1.0, %v2724_v30  ;;  %v2920_v40 = vsel %vm595_vm7, 1.0, %v2724_v30  ;;  %v2929_v44 = vsel %vm596_vm8, 1.0, %v2724_v30  ;;  %v2936_v46 = vsel %vm611_vm9, 1.0, %v2724_v30 }
  0x5d   : > { %v2939_v48 = vsel %vm612_vm11, 1.0, %v2724_v30  ;;  %v2953_v53 = vmul.f32 %v2929_v44, %v2900_v32  ;;  %v2957_v54 = vsel %vm565_vm12, 1.0, %v2724_v30  ;;  %vm598_vm15 = vcmp.gt.f32.partialorder %v558_v41, 0.5 }
  0x5e   : > { %2329 = vmatpush3.bf16.msra.mxu0 %v2608_v31  ;;  %v2896_v31 = vsel %vm562_vm0, 1.0, %v2724_v30  ;;  %3767 = vst [vmem:[#allocation6_spill] sm:$0xff] %v2939_v48  ;;  %v2969_v57 = vmul.f32 %v2939_v48, %v2900_v32  ;;  %vm613_vm0 = vcmp.lt.f32.partialorder %v557_v36, 6.5  ;;  %v2976_v59 = vsel %vm597_vm13, 1.0, %v2724_v30 }
  0x5f   : > { %2330 = vmatprep.subr.bf16.mxu0 %v2611_v34  ;;  %v2904_v34 = vsel %vm610_vm2, 1.0, %v2724_v30  ;;  %vm614_vm1 = vcmp.lt.f32.partialorder %v558_v41, 6.5  ;;  %v2981_v61 = vsel %vm566_vm14, 1.0, %v2724_v30  ;;  %v2984_v62 = vsel %vm598_vm15, 1.0, %v2724_v30 }
  0x60   : > { %v2944_v50 = vmul.f32 %v2904_v34, %v2896_v31  ;;  %vm578_vm2 = vcmp.lt.f32.partialorder %v2867_v4, 6.5  ;;  %v2996_v1 = vsel %vm613_vm0, 1.0, %v2724_v30  ;;  %v3000_v2 = vmul.f32 %v2976_v59, %v2957_v54 }
  0x61   : > { %3768 = vst [vmem:[#allocation7_spill] sm:$0xff] %v2996_v1  ;;  %v3003_v3 = vsel %vm614_vm1, 1.0, %v2724_v30  ;;  %v3008_v4 = vmul.f32 %v2984_v62, %v2981_v61  ;;  %v3011_v5 = vsel %vm578_vm2, 1.0, %v2724_v30  ;;  %vm579_vm9 = vcmp.lt.f32.partialorder %v2874_v9, 6.5 }
  0x62   : > { %2331 = vmatpush3.bf16.msra.mxu0 %v2612_v35  ;;  %v2906_v35 = vfloor.f32 %v535_v27  ;;  %3769 = vst [vmem:[#allocation8_spill] sm:$0xff] %v3003_v3  ;;  %vm580_vm11 = vcmp.lt.f32.partialorder %v2876_v10, 6.5  ;;  %v3046_v16 = vsel %vm579_vm9, 1.0, %v2724_v30  ;;  %vm581_vm12 = vcmp.lt.f32.partialorder %v2886_v21, 6.5  ;;  %v3066_v10 = vld [vmem:[%s3741_s7] ss:$0 sm:$0xff] }
  0x63   : > { %2332 = vmatprep.subr.bf16.mxu0 %v2615_v38  ;;  %v2912_v38 = vsel %vm593_vm4, 1.0, %v2724_v30  ;;  %vm568_vm4 = vcmp.gt.f32.partialorder %v2909_v37, 0.5  ;;  %3771 = vst [vmem:[#allocation10_spill] sm:$0xff] %v3046_v16  ;;  %vm584_vm14 = vcmp.lt.f32.partialorder %v2909_v37, 6.5  ;;  %vm582_vm15 = vcmp.lt.f32.partialorder %v2890_v23, 6.5 }
  0x64   : > { %v551_v49 = vmul.f32 8.0, %v2906_v35  ;;  %v3017_v7 = vsel %vm568_vm4, 1.0, %v2724_v30  ;;  %vm583_vm13 = vcmp.lt.f32.partialorder %v2906_v35, 6.5  ;;  %vm698_vm0 = vcmp.lt.s32.totalorder %v2856_v47, 7 }
  0x65   : > { %vm641_vm1 = vcmp.lt.s32.totalorder %v2856_v47, 1  ;;  %v3083_v23 = vsel %vm580_vm11, 1.0, %v2724_v30  ;;  %v3087_v24 = vmul.f32 %v2920_v40, %v3046_v16  ;;  %v3090_v25 = vsel %vm581_vm12, 1.0, %v2724_v30 }
  0x66   : > { %2333 = vmatpush3.bf16.msra.mxu0 %v2616_v39  ;;  %v2917_v39 = vsel %vm563_vm3, 1.0, %v2724_v30  ;;  %v559_v60 = vsub.f32 %v519_v11, %v551_v49  ;;  %vm567_vm3 = vcmp.gt.f32.partialorder %v2906_v35, 0.5  ;;  %v3021_v11 = vmul.f32 %v2996_v1, %v2957_v54  ;;  %3773 = vst [vmem:[#allocation12_spill] sm:$0xff] %v3083_v23  ;;  %3775 = vst [vmem:[#allocation14_spill] sm:$0xff] %v3090_v25 }
  0x67   : > { %2334 = vmatprep.subr.bf16.mxu0 %v2619_v42  ;;  %v2923_v42 = vsel %vm594_vm5, 1.0, %v2724_v30  ;;  %v2948_v51 = vmul.f32 %v2920_v40, %v2917_v39  ;;  %v2965_v56 = vmul.f32 %v2936_v46, %v2917_v39  ;;  %vm600_vm5 = vcmp.gt.f32.partialorder %v560_v63, 0.5  ;;  %3774 = vst [vmem:[#allocation13_spill] sm:$0xff] %v3087_v24 }
  0x68   : > { %v2973_v58 = vmul.f32 %v2923_v42, %v2896_v31  ;;  %vm599_vm7 = vcmp.gt.f32.partialorder %v559_v60, 0.5  ;;  %vm615_vm8 = vcmp.lt.f32.partialorder %v559_v60, 6.5  ;;  %v3014_v6 = vsel %vm567_vm3, 1.0, %v2724_v30 }
  0x69   : > { %v3029_v12 = vsel %vm600_vm5, 1.0, %v2724_v30  ;;  %v3035_v14 = vsel %vm599_vm7, 1.0, %v2724_v30  ;;  %v3038_v15 = vsel %vm615_vm8, 1.0, %v2724_v30  ;;  %v3042_v9 = vmul.f32 %v2923_v42, %v3011_v5 }
  0x6a   : > { %2335 = vmatpush3.bf16.msra.mxu0 %v2620_v43  ;;  %v2926_v43 = vsel %vm609_vm6, 1.0, %v2724_v30  ;;  %vm577_vm6 = vcmp.lt.f32.partialorder %v2872_v8, 6.5  ;;  %v3026_v8 = vmul.f32 %v3003_v3, %v2981_v61  ;;  %3770 = vst [vmem:[#allocation9_spill] sm:$0xff] %v3038_v15  ;;  %v3053_v17 = vmul.f32 %v3029_v12, %v3017_v7 }
  0x6b   : > { %2400 = vmatprep.subr.bf16.mxu0 %v2623_v45  ;;  %v2933_v45 = vsel %vm561_vm10, 1.0, %v2724_v30  ;;  %vm616_vm10 = vcmp.lt.f32.partialorder %v560_v63, 6.5  ;;  %v3032_v13 = vsel %vm577_vm6, 1.0, %v2724_v30  ;;  %v3072_v20 = vmul.f32 %v3035_v14, %v3014_v6 }
  0x6c   : > { %v2961_v55 = vmul.f32 %v2912_v38, %v2933_v45  ;;  %v2991_v0 = vmul.f32 %v2926_v43, %v2933_v45  ;;  %v3056_v18 = vsel %vm616_vm10, 1.0, %v2724_v30  ;;  %v3060_v19 = vmul.f32 %v2912_v38, %v3032_v13 }
  0x6d   : > { %3772 = vst [vmem:[#allocation11_spill] sm:$0xff] %v3056_v18  ;;  %v3076_v21 = vmul.f32 %v3038_v15, %v3014_v6  ;;  %v3080_v22 = vmul.f32 %v3056_v18, %v3017_v7  ;;  %v3093_v26 = vsel %vm583_vm13, 1.0, %v2724_v30  ;;  %v3096_v27 = vsel %vm584_vm14, 1.0, %v2724_v30 }
  0x6e   : > { %3776 = vst [vmem:[#allocation15_spill] sm:$0xff] %v3093_v26  ;;  %3777 = vst [vmem:[#allocation16_spill] sm:$0xff] %v3096_v27  ;;  %v3100_v29 = vmul.f32 %v2936_v46, %v3046_v16  ;;  %v3103_v33 = vsel %vm582_vm15, 1.0, %v2724_v30  ;;  %v3107_v35 = vmul.f32 %v2926_v43, %v3032_v13  ;;  %v3111_v36 = vmul.f32 %v2904_v34, %v3011_v5 }
  0x6f   : > { %3779 = vst [vmem:[#allocation18_spill] sm:$0xff] %v3103_v33  ;;  %v3116_v49 = vmul.f32 %v2939_v48, %v3083_v23  ;;  %v3120_v52 = vmul.f32 %v2929_v44, %v3083_v23  ;;  %v3124_v30 = vmul.f32 %v3056_v18, %v3096_v27 }
  0x70   : > { %3778 = vst [vmem:[#allocation17_spill] sm:$0xff] %v3100_v29  ;;  %3780 = vst [vmem:[#allocation19_spill] sm:$0xff] %v3107_v35  ;;  %v3137_v35 = vmul.f32 %v3035_v14, %v3093_v26 }
  0x71   : > { %3781 = vst [vmem:[#allocation20_spill] sm:$0xff] %v3111_v36  ;;  %3782 = vst [vmem:[#allocation21_spill] sm:$0xff] %v3116_v49  ;;  %v3129_v36 = vmul.f32 %v2976_v59, %v3090_v25 }
  0x72   : > { %3783 = vst [vmem:[#allocation22_spill] sm:$0xff] %v3120_v52  ;;  %3784 = vst [vmem:[#allocation23_spill] sm:$0xff] %v3124_v30 }
  0x73   : > { %3785 = vst [vmem:[#allocation24_spill] sm:$0xff] %v3129_v36  ;;  %3787 = vst [vmem:[#allocation26_spill] sm:$0xff] %v3137_v35  ;;  %v3148_v36 = vmul.f32 %v3003_v3, %v3103_v33  ;;  %v3155_v35 = vmul.f32 %v2996_v1, %v3090_v25 }
  0x75   : > { %3790 = vst [vmem:[#allocation29_spill] sm:$0xff] %v3148_v36  ;;  %3792 = vst [vmem:[#allocation31_spill] sm:$0xff] %v3155_v35 }
 0x120   : > { %v2482_v28 = vpop.f32.mrb[0].mxu0 }
 0x121   : > { %v470_v37 = vadd.f32 %v2482_v28, %v3066_v10  ;;  %v461_v41 = vpop.f32.mrb[1].mxu0  ;;  %v3133_v28 = vmul.f32 %v2984_v62, %v3103_v33 }
 0x122   : > { %v462_v60 = vadd.f32 %v3066_v10, %v461_v41  ;;  %v2483_v63 = vpop.f32.mrb[2].mxu0  ;;  %v3144_v41 = vmul.f32 %v3029_v12, %v3096_v27 }
 0x123   : > { %3786 = vst [vmem:[#allocation25_spill] sm:$0xff] %v3133_v28  ;;  %v3139_v52 = vmax.f32 %v470_v37, 0.0  ;;  %v473_v18 = vadd.f32 %v2483_v63, %v3066_v10  ;;  %v464_v30 = vpop.f32.mrb[3].mxu0  ;;  %v3159_v37 = vmul.f32 %v3038_v15, %v3093_v26 }
 0x124   : > { %3789 = vst [vmem:[#allocation28_spill] sm:$0xff] %v3144_v41  ;;  %v3150_v24 = vmax.f32 %v462_v60, 0.0  ;;  %v465_v28 = vadd.f32 %v3066_v10, %v464_v30 }
 0x125   : > { %3788 = vst [vmem:[#allocation27_spill] sm:$0xff] %v3139_v52  ;;  %3793 = vst [vmem:[#allocation32_spill] sm:$0xff] %v3159_v37  ;;  %v3161_v63 = vmax.f32 %v473_v18, 0.0  ;;  %v3165_v41 = vmul.f32 %v2900_v32, %v3139_v52  ;;  %v635_v36 = vrot.slane %v3139_v52, 7  ;;  %v692_v60 = vrot.slane %v3139_v52, 1 }
 0x126   : > { %3791 = vst [vmem:[#allocation30_spill] sm:$0xff] %v3150_v24  ;;  %v690_v30 = vrot.slane %v3150_v24, 1  ;;  %v3170_v27 = vmax.f32 %v465_v28, 0.0  ;;  %v667_v35 = vmul.f32 %v2896_v31, %v3150_v24  ;;  %v633_v26 = vrot.slane %v3150_v24, 7 }
 0x127   : > { %v3178_v37 = vmul.f32 %v2957_v54, %v3161_v63  ;;  %v3183_v15 = vmul.f32 %v3011_v5, %v3139_v52  ;;  %v3795_v3 = vrot.slane %v3161_v63, 7  ;;  %v3796_v1 = vrot.slane %v3161_v63, 1 }
 0x128   : > { %3794 = vst [vmem:[#allocation33_spill] sm:$0xff] %v3170_v27  ;;  %v691_v28 = vrot.slane %v3170_v27, 1  ;;  %v2486_v33 = vpop.f32.mrb[4].mxu0  ;;  %v634_v25 = vrot.slane %v3170_v27, 7  ;;  %v3189_v31 = vmul.f32 %v2917_v39, %v3170_v27  ;;  %v3193_v18 = vmul.f32 %v3032_v13, %v3170_v27 }
 0x129   : > { %v486_v54 = vadd.f32 %v2486_v33, %v3066_v10  ;;  %v477_v32 = vpop.f32.mrb[5].mxu0  ;;  %v3200_v5 = vsel %vm641_vm1, %v635_v36, %v3795_v3  ;;  %v3206_v52 = vsel %vm698_vm0, %v692_v60, %v3796_v1 }
 0x12a   : > { %v478_v13 = vadd.f32 %v3066_v10, %v477_v32  ;;  %v2487_v49 = vpop.f32.mrb[6].mxu0  ;;  %v3213_v33 = vsel %vm698_vm0, %v690_v30, %v691_v28  ;;  %v3217_v3 = vsel %vm641_vm1, %v633_v26, %v634_v25  ;;  %v675_v29 = vpack.c.bf16 %v3165_v41, %v3189_v31 }
 0x12b   : > { %v3221_v23 = vmax.f32 %v486_v54, 0.0  ;;  %v489_v1 = vadd.f32 %v2487_v49, %v3066_v10  ;;  %v480_v16 = vpop.f32.mrb[7].mxu0  ;;  %v708_v32 = vmul.f32 %v3213_v33, %v2944_v50  ;;  %v724_v39 = vmul.f32 %v3217_v3, %v2923_v42 }
 0x12c   : > { %v3228_v27 = vmax.f32 %v478_v13, 0.0  ;;  %v481_v24 = vadd.f32 %v3066_v10, %v480_v16  ;;  %v3233_v48 = vsel %vm641_vm1, %v634_v25, %v635_v36  ;;  %v726_v41 = vmul.f32 %v3200_v5, %v2929_v44 }
 0x12d   : > { %v3237_v31 = vmax.f32 %v489_v1, 0.0  ;;  %v639_v49 = vrot.slane %v3221_v23, 7  ;;  %v725_v50 = vmul.f32 %v3233_v48, %v2920_v40  ;;  %v3244_v42 = vmul.f32 %v3217_v3, %v2948_v51 }
 0x12e   : > { %v3246_v54 = vmax.f32 %v481_v24, 0.0  ;;  %v3250_v16 = vmul.f32 %v3233_v48, %v2953_v53  ;;  %v3254_v44 = vmul.f32 %v2981_v61, %v3228_v27  ;;  %v3258_v10 = vsel %vm698_vm0, %v691_v28, %v692_v60 }
 0x12f   : > { %v3761_v40 = vrot.slane %v3237_v31, 1  ;;  %v666_v51 = vmul.f32 %v2933_v45, %v3237_v31  ;;  %v640_v24 = vrot.slane %v3237_v31, 7  ;;  %v732_v25 = vpack.c.bf16 %v726_v41, %v725_v50  ;;  %v2622_v41 = vld [vmem:[#allocation3 + $0x100] sm:$0xff]  }
 0x130   : > { %v3270_v61 = vmul.f32 %v3258_v10, %v2965_v56  ;;  %v3274_v60 = vmul.f32 %v3206_v52, %v2969_v57  ;;  %v3797_v53 = vrot.slane %v3161_v63, 7 }
 0x131   : > { %v674_v28 = vpack.c.bf16 %v667_v35, %v666_v51  ;;  %v3280_v45 = vsel %vm698_vm0, %v3761_v40, %v690_v30  ;;  %v3284_v13 = vsel %vm641_vm1, %v639_v49, %v640_v24  ;;  %v3288_v1 = vsel %vm641_vm1, %v640_v24, %v633_v26 }
 0x132   : > { %v707_v56 = vmul.f32 %v3280_v45, %v2991_v0  ;;  %v650_v57 = vmul.f32 %v3284_v13, %v2961_v55  ;;  %v651_v35 = vmul.f32 %v3288_v1, %v2973_v58  ;;  %v723_v30 = vmul.f32 %v3288_v1, %v2912_v38  ;;  %v2625_v58 = vld [vmem:[#allocation3 + $0x148] sm:$0xff]  }
 0x133   : > { %1471 = vmatprep.mubr.bf16.mxu1 %v674_v28  ;;  %v637_v26 = vrot.slane %v3228_v27, 7  ;;  %v638_v51 = vrot.slane %v3246_v54, 7  ;;  %v3304_v0 = vmul.f32 %v3200_v5, %v3000_v2  ;;  %v3308_v38 = vmul.f32 %v3014_v6, %v3246_v54  ;;  %v2624_v28 = vld [vmem:[#allocation3 + $0x180] sm:$0xff]   ;;  %v2627_v6 = vld [vmem:[#allocation3 + $0x1c8] sm:$0xff]  }
 0x134   : > { %v715_v55 = vpack.c.bf16 %v708_v32, %v707_v56  ;;  %v658_v24 = vpack.c.bf16 %v651_v35, %v650_v57  ;;  %v731_v36 = vpack.c.bf16 %v724_v39, %v723_v30  ;;  %v3322_v2 = vmul.f32 %v3017_v7, %v3221_v23  ;;  %v2626_v57 = vld [vmem:[#allocation3 + $0x108] sm:$0xff]  }
 0x135   : > { %v3312_v50 = vsel %vm641_vm1, %v637_v26, %v638_v51  ;;  %v3318_v40 = vsel %vm641_vm1, %v3797_v53, %v637_v26  ;;  %v694_v39 = vrot.slane %v3228_v27, 1  ;;  %v695_v7 = vrot.slane %v3246_v54, 1 }
 0x136   : > { %1472 = vmatmul.mubr.bf16.vlgmr.msra.gmra.mrb[0].mxu1 %v658_v24  ;;  %1536 = vmatprep.mubr.bf16.mxu0 %v731_v36  ;;  %v3327_v32 = vmul.f32 %v3318_v40, %v2976_v59  ;;  %v3331_v56 = vmul.f32 %v3312_v50, %v2984_v62  ;;  %v3335_v53 = vmul.f32 %v3318_v40, %v3008_v4  ;;  %v3798_v35 = vrot.slane %v3161_v63, 1  ;;  %v2629_v4 = vld [vmem:[#allocation3 + $0x150] sm:$0xff]   ;;  %v2628_v24 = vld [vmem:[#allocation3 + $0x188] sm:$0xff]  }
 0x137   : > { %2361 = vmatpush3.bf16.msra.mxu1 %v2622_v41  ;;  %1479 = vmatprep.mubr.bf16.mxu1 %v675_v29  ;;  %v3346_v62 = vsel %vm641_vm1, %v638_v51, %v639_v49  ;;  %v701_v41 = vsel %vm698_vm0, %v694_v39, %v695_v7  ;;  %v696_v26 = vrot.slane %v3221_v23, 1  ;;  %v3821_v29 = vld [vmem:[#allocation16_spill] sm:$0xff] }
 0x138   : > { %v702_v59 = vsel %vm698_vm0, %v3798_v35, %v694_v39  ;;  %1537 = vmatmul.mubr.bf16.vlgmr.msra.gmra.mrb[8].mxu0 %v715_v55  ;;  %2362 = vmatprep.subr.bf16.mxu1 %v2625_v58  ;;  %v733_v30 = vpack.c.bf16 %v3331_v56, %v3327_v32  ;;  %v3359_v51 = vmul.f32 %v701_v41, %v3026_v8  ;;  %v2631_v58 = vld [vmem:[#allocation3 + $0x1d0] sm:$0xff]   ;;  %v3799_v8 = vrot.slane %v3237_v31, 1  ;;  %v2633_v32 = vld [vmem:[#allocation3 + $0x158] sm:$0xff]  }
 0x139   : > { %1544 = vmatprep.mubr.bf16.mxu0 %v732_v25  ;;  %2401 = vmatpush3.bf16.msra.mxu0 %v2624_v28  ;;  %v3356_v49 = vmul.f32 %v702_v59, %v3021_v11  ;;  %v3363_v55 = vmul.f32 %v3346_v62, %v3035_v14  ;;  %v3367_v39 = vmul.f32 %v3284_v13, %v3029_v12  ;;  %v2630_v28 = vld [vmem:[#allocation3 + $0x110] sm:$0xff]   ;;  %v2640_v12 = vld [vmem:[#allocation3 + $0x1a0] sm:$0xff]  }
 0x13a   : > { %2402 = vmatprep.subr.bf16.mxu0 %v2627_v6  ;;  %v3371_v25 = vmul.f32 %v3312_v50, %v3072_v20  ;;  %v3375_v11 = vmul.f32 %v3346_v62, %v3053_v17  ;;  %v3381_v14 = vsel %vm698_vm0, %v696_v26, %v3799_v8  ;;  %v3387_v6 = vsel %vm698_vm0, %v695_v7, %v696_v26  ;;  %v2632_v35 = vld [vmem:[#allocation3 + $0x190] sm:$0xff]   ;;  %v2634_v8 = vld [vmem:[#allocation3 + $0x118] sm:$0xff]  }
 0x13b   : > { %2363 = vmatpush3.bf16.msra.mxu1 %v2626_v57  ;;  %v3391_v20 = vmul.f32 %v3381_v14, %v3080_v22  ;;  %v3395_v17 = vmul.f32 %v3213_v33, %v2926_v43  ;;  %v3403_v7 = vmul.f32 %v3387_v6, %v3076_v21  ;;  %v3407_v22 = vmul.f32 %v3258_v10, %v2904_v34  ;;  %v3815_v57 = vld [vmem:[#allocation9_spill] sm:$0xff] }
 0x13c   : > { %2364 = vmatprep.subr.bf16.mxu1 %v2629_v4  ;;  %v3411_v43 = vmul.f32 %v3060_v19, %v3217_v3  ;;  %v3415_v4 = vmul.f32 %v3042_v9, %v3233_v48  ;;  %v3421_v21 = vmul.f32 %v3206_v52, %v2936_v46  ;;  %v3800_v34 = vpack.c.bf16 %v3250_v16, %v3244_v42  ;;  %v3801_v9 = vld [vmem:[#allocation6_spill] sm:$0xff]  ;;  %v3807_v42 = vld [vmem:[#allocation21_spill] sm:$0xff]  ;;  %v3808_v48 = vld [vmem:[#allocation27_spill] sm:$0xff] }
 0x13d   : > { %2403 = vmatpush3.bf16.msra.mxu0 %v2628_v24  ;;  %v2635_v24 = vld [vmem:[#allocation3 + $0x1d8] sm:$0xff]   ;;  %v3431_v3 = vmul.f32 %v702_v59, %v3801_v9  ;;  %v3802_v46 = vpack.c.bf16 %v3254_v44, %v3178_v37  ;;  %v3803_v16 = vld [vmem:[#allocation10_spill] sm:$0xff]  ;;  %v3805_v9 = vpack.c.bf16 %v3274_v60, %v3270_v61  ;;  %v3455_v19 = vmul.f32 %v3807_v42, %v701_v41  ;;  %v3809_v60 = vld [vmem:[#allocation7_spill] sm:$0xff] }
 0x13e   : > { %1480 = vmatmul.mubr.bf16.gmra.mrb[4].mxu1 %v3800_v34  ;;  %2404 = vmatprep.subr.bf16.mxu0 %v2631_v58  ;;  %v3440_v58 = vmul.f32 %v3803_v16, %v3161_v63  ;;  %v3804_v34 = vld [vmem:[#allocation12_spill] sm:$0xff]  ;;  %v3806_v44 = vld [vmem:[#allocation17_spill] sm:$0xff] }
 0x13f   : > { %2365 = vmatpush3.bf16.msra.mxu1 %v2630_v28  ;;  %1487 = vmatprep.mubr.bf16.mxu1 %v3802_v46  ;;  %v3444_v26 = vmul.f32 %v3804_v34, %v3228_v27  ;;  %v2637_v28 = vld [vmem:[#allocation3 + $0x160] sm:$0xff]   ;;  %v3452_v46 = vmul.f32 %v3806_v44, %v702_v59  ;;  %v2636_v16 = vld [vmem:[#allocation3 + $0x198] sm:$0xff]   ;;  %v3810_v37 = vld [vmem:[#allocation8_spill] sm:$0xff] }
 0x140   : > { %1545 = vmatmul.mubr.bf16.gmra.mrb[12].mxu0 %v3805_v9  ;;  %2366 = vmatprep.subr.bf16.mxu1 %v2633_v32  ;;  %v3462_v32 = vmul.f32 %v701_v41, %v3809_v60  ;;  %v2639_v9 = vld [vmem:[#allocation3 + $0x1e0] sm:$0xff]   ;;  %v3466_v59 = vmul.f32 %v3387_v6, %v3810_v37  ;;  %v3811_v42 = vld [vmem:[#allocation13_spill] sm:$0xff] }
 0x141   : > { %1552 = vmatprep.mubr.bf16.mxu0 %v733_v30  ;;  %2405 = vmatpush3.bf16.msra.mxu0 %v2632_v35  ;;  %v3470_v30 = vmul.f32 %v3811_v42, %v3200_v5  ;;  %v3812_v35 = vld [vmem:[#allocation22_spill] sm:$0xff]  ;;  %v3488_v5 = vmul.f32 %v3381_v14, %v3815_v57  ;;  %v3816_v42 = vld [vmem:[#allocation11_spill] sm:$0xff]  ;;  %v3818_v37 = vld [vmem:[#allocation25_spill] sm:$0xff] }
 0x142   : > { %2406 = vmatprep.subr.bf16.mxu0 %v2635_v24  ;;  %v3474_v44 = vmul.f32 %v3812_v35, %v3318_v40  ;;  %v3813_v34 = vld [vmem:[#allocation14_spill] sm:$0xff]  ;;  %v3492_v40 = vmul.f32 %v3280_v45, %v3816_v42  ;;  %v3504_v57 = vmul.f32 %v3818_v37, %v3346_v62  ;;  %v3822_v62 = vpack.c.bf16 %v3335_v53, %v3304_v0  ;;  %v3825_v53 = vld [vmem:[#allocation28_spill] sm:$0xff] }
 0x143   : > { %v3478_v61 = vmul.f32 %v3813_v34, %v3246_v54  ;;  %2367 = vmatpush3.bf16.msra.mxu1 %v2634_v8  ;;  %v2638_v41 = vld [vmem:[#allocation3 + $0x120] sm:$0xff]   ;;  %v2641_v34 = vld [vmem:[#allocation3 + $0x168] sm:$0xff]  }
 0x144   : > { %v3814_v24 = vld [vmem:[#allocation18_spill] sm:$0xff]  ;;  %2368 = vmatprep.subr.bf16.mxu1 %v2637_v28  ;;  %v3819_v8 = vld [vmem:[#allocation15_spill] sm:$0xff] }
 0x145   : > { %v3482_v60 = vmul.f32 %v3814_v24, %v3221_v23  ;;  %v3817_v24 = vld [vmem:[#allocation24_spill] sm:$0xff]  ;;  %2407 = vmatpush3.bf16.msra.mxu0 %v2636_v16  ;;  %v3512_v36 = vmul.f32 %v3819_v8, %v3237_v31  ;;  %v3820_v35 = vld [vmem:[#allocation30_spill] sm:$0xff]  ;;  %v2643_v16 = vld [vmem:[#allocation3 + $0x1e8] sm:$0xff]  }
 0x146   : > { %v3500_v56 = vmul.f32 %v3817_v24, %v3312_v50  ;;  %v3516_v50 = vmul.f32 %v3821_v29, %v3820_v35  ;;  %1488 = vmatmul.mubr.bf16.gmra.mrb[8].mxu1 %v3822_v62  ;;  %2408 = vmatprep.subr.bf16.mxu0 %v2639_v9  ;;  %v3823_v42 = vld [vmem:[#allocation26_spill] sm:$0xff]  ;;  %v3824_v29 = vpack.c.bf16 %v3322_v2, %v3308_v38  ;;  %v2642_v28 = vld [vmem:[#allocation3 + $0x128] sm:$0xff]   ;;  %v3828_v38 = vld [vmem:[#allocation20_spill] sm:$0xff] }
 0x147   : > { %v3527_v8 = vmul.f32 %v3823_v42, %v3284_v13  ;;  %2369 = vmatpush3.bf16.msra.mxu1 %v2638_v41  ;;  %v3536_v9 = vmul.f32 %v3825_v53, %v3288_v1  ;;  %v3826_v62 = vld [vmem:[#allocation19_spill] sm:$0xff]  ;;  %v3827_v13 = vpack.c.bf16 %v3359_v51, %v3356_v49  ;;  %v2645_v41 = vld [vmem:[#allocation3 + $0x170] sm:$0xff]   ;;  %v3547_v2 = vmul.f32 %v3828_v38, %v3206_v52 }
 0x148   : > { %v777_v37 = vpack.c.bf16 %v3504_v57, %v3500_v56  ;;  %1495 = vmatprep.mubr.bf16.mxu1 %v3824_v29  ;;  %v794_v0 = vpack.c.bf16 %v3516_v50, %v3512_v36  ;;  %v3540_v24 = vmul.f32 %v3826_v62, %v3258_v10  ;;  %2370 = vmatprep.subr.bf16.mxu1 %v2641_v34  ;;  %v3829_v1 = vld [vmem:[#allocation31_spill] sm:$0xff]  ;;  %v3831_v34 = vld [vmem:[#allocation29_spill] sm:$0xff]  ;;  %v3832_v53 = vld [vmem:[#allocation32_spill] sm:$0xff] }
 0x149   : > { %1553 = vmatmul.mubr.bf16.gmra.mrb[16].mxu0 %v3827_v13  ;;  %v816_v42 = vpack.c.bf16 %v3455_v19, %v3452_v46  ;;  %v3553_v29 = vmul.f32 %v3829_v1, %v3387_v6  ;;  %v3830_v10 = vpack.c.bf16 %v3367_v39, %v3363_v55  ;;  %v2644_v49 = vld [vmem:[#allocation3 + $0x1a8] sm:$0xff]   ;;  %v778_v51 = vpack.c.bf16 %v3536_v9, %v3527_v8  ;;  %v2647_v6 = vld [vmem:[#allocation3 + $0x1f0] sm:$0xff]   ;;  %v2664_v36 = vld [vmem:[%s3737_s3 + $0x18] sm:$0xff]  }
 0x14a   : > { %2409 = vmatpush3.bf16.msra.mxu0 %v2640_v12  ;;  %v3562_v52 = vmul.f32 %v3831_v34, %v3381_v14  ;;  %v3566_v62 = vmul.f32 %v3832_v53, %v3280_v45  ;;  %v815_v13 = vpack.c.bf16 %v3547_v2, %v3540_v24  ;;  %v3833_v55 = vld [vmem:[#allocation23_spill] sm:$0xff]  ;;  %v2646_v12 = vld [vmem:[#allocation3 + $0x130] sm:$0xff]   ;;  %v2649_v14 = vld [vmem:[#allocation3 + $0x178] sm:$0xff]   ;;  %v3834_v1 = vpack.c.bf16 %v3375_v11, %v3371_v25 }
 0x14b   : > { %1560 = vmatprep.mubr.bf16.mxu0 %v3830_v10  ;;  %2410 = vmatprep.subr.bf16.mxu0 %v2643_v16  ;;  %v3572_v39 = vmul.f32 %v3833_v55, %v3213_v33  ;;  %v2648_v16 = vld [vmem:[#allocation3 + $0x1b0] sm:$0xff]   ;;  %v2651_v24 = vld [vmem:[#allocation3 + $0x1f8] sm:$0xff]   ;;  %v3835_v33 = vpack.c.bf16 %v3407_v22, %v3395_v17  ;;  %v2653_v2 = vld [vmem:[#allocation3 + $0x200] sm:$0xff]  }
 0x14c   : > { %2371 = vmatpush3.bf16.msra.mxu1 %v2642_v28  ;;  %v817_v38 = vpack.c.bf16 %v3562_v52, %v3553_v29  ;;  %v2650_v28 = vld [vmem:[#allocation3 + $0x138] sm:$0xff]   ;;  %v3837_v29 = vpack.c.bf16 %v3183_v15, %v3193_v18  ;;  %v2654_v11 = vld [vmem:[#allocation3 + $0x208] sm:$0xff]   ;;  %v2655_v15 = vld [vmem:[#allocation3 + $0x210] sm:$0xff]   ;;  %v3842_v18 = vpack.c.bf16 %v3444_v26, %v3440_v58  ;;  %v3846_v26 = vpack.c.bf16 %v3482_v60, %v3478_v61 }
 0x14d   : > { %2372 = vmatprep.subr.bf16.mxu1 %v2645_v41  ;;  %v818_v45 = vpack.c.bf16 %v3572_v39, %v3566_v62  ;;  %v3836_v41 = vpack.c.bf16 %v3391_v20, %v3403_v7  ;;  %v2652_v25 = vld [vmem:[#allocation3 + $0x1b8] sm:$0xff]   ;;  %v3840_v20 = vpack.c.bf16 %v3431_v3, %v3421_v21  ;;  %v3841_v7 = vpack.c.bf16 %v3415_v4, %v3411_v43  ;;  %v2657_v4 = vld [vmem:[#allocation3 + $0x220] sm:$0xff]   ;;  %v2658_v3 = vld [vmem:[#allocation3 + $0x228] sm:$0xff]  }
 0x14e   : > { %2411 = vmatpush3.bf16.msra.mxu0 %v2644_v49  ;;  %1496 = vmatmul.mubr.bf16.gmra.mrb[12].mxu1 %v3834_v1  ;;  %v3838_v17 = vld [vmem:[#allocation33_spill] sm:$0xff]  ;;  %v3844_v21 = vpack.c.bf16 %v3466_v59, %v3462_v32  ;;  %v3845_v43 = vpack.c.bf16 %v3474_v44, %v3470_v30  ;;  %v2659_v58 = vld [vmem:[#allocation3 + $0x230] sm:$0xff]   ;;  %v2665_v56 = vld [vmem:[%s3737_s3 + $0x20] sm:$0xff]  }
 0x14f   : > { %2412 = vmatprep.subr.bf16.mxu0 %v2647_v6  ;;  %1601 = vmatprep.mubr.bf16.mxu1 %v3835_v33  ;;  %v3839_v22 = vpack.c.bf16 %v3838_v17, %v3820_v35  ;;  %v2656_v10 = vld [vmem:[#allocation3 + $0x218] sm:$0xff]   ;;  %v3843_v35 = vpack.c.bf16 %v3161_v63, %v3808_v48  ;;  %v3847_v63 = vpack.c.bf16 %v3246_v54, %v3228_v27  ;;  %v2661_v54 = vld [vmem:[%s3737_s3] sm:$0xff]   ;;  %v2666_v19 = vld [vmem:[%s3737_s3 + $0x28] sm:$0xff]  }
 0x150   : > { %2373 = vmatpush3.bf16.msra.mxu1 %v2646_v12  ;;  %v3848_v48 = vpack.c.bf16 %v3492_v40, %v3488_v5  ;;  %v2660_v61 = vld [vmem:[#allocation3 + $0x238] sm:$0xff]   ;;  %v3849_v27 = vpack.c.bf16 %v3237_v31, %v3221_v23  ;;  %v2662_v23 = vld [vmem:[%s3737_s3 + $0x8] sm:$0xff]   ;;  %v2663_v31 = vld [vmem:[%s3737_s3 + $0x10] sm:$0xff]  }
 0x151   : > { %1561 = vmatmul.mubr.bf16.gmra.mrb[20].mxu0 %v3836_v41  ;;  %2374 = vmatprep.subr.bf16.mxu1 %v2649_v14  ;;  %v2667_v46 = vld [vmem:[%s3737_s3 + $0x30] sm:$0xff]   ;;  %v2668_v32 = vld [vmem:[%s3737_s3 + $0x38] sm:$0xff]   ;;  %v2141_v30 = vld [vmem:[%s3741_s7 + $0x1] ss:$0 sm:$0xff] }
 0x152   : > { %2413 = vmatpush3.bf16.msra.mxu0 %v2648_v16  ;;  %1666 = vmatprep.mubr.bf16.mxu0 %v3837_v29 }
 0x153   : > { %2414 = vmatprep.subr.bf16.mxu0 %v2651_v24 }
 0x154   : > { %2375 = vmatpush3.bf16.msra.mxu1 %v2650_v28 }
 0x155   : > { %2488 = vmatprep.subr.bf16.mxu1 %v2653_v2 }
 0x156   : > { %2415 = vmatpush3.bf16.msra.mxu0 %v2652_v25 }
 0x157   : > { %1602 = vmatmul.mubr.bf16.vlgmr.msra.gmra.mrb[16].mxu1 %v3839_v22  ;;  %2512 = vmatprep.subr.bf16.mxu0 %v2661_v54 }
 0x158   : > { %2489 = vmatpush3.bf16.msra.mxu1 %v2653_v2  ;;  %1609 = vmatprep.mubr.bf16.mxu1 %v3840_v20 }
 0x159   : > { %1667 = vmatmul.mubr.bf16.vlgmr.msra.gmra.mrb[24].mxu0 %v3841_v7  ;;  %2490 = vmatprep.subr.bf16.mxu1 %v2654_v11 }
 0x15a   : > { %1674 = vmatprep.mubr.bf16.mxu0 %v3842_v18  ;;  %2513 = vmatpush3.bf16.msra.mxu0 %v2661_v54 }
 0x15b   : > { %2514 = vmatprep.subr.bf16.mxu0 %v2662_v23 }
 0x15c   : > { %2491 = vmatpush3.bf16.msra.mxu1 %v2654_v11 }
 0x15d   : > { %2492 = vmatprep.subr.bf16.mxu1 %v2655_v15 }
 0x15e   : > { %2515 = vmatpush3.bf16.msra.mxu0 %v2662_v23 }
 0x15f   : > { %1610 = vmatmul.mubr.bf16.gmra.mrb[20].mxu1 %v3843_v35  ;;  %2516 = vmatprep.subr.bf16.mxu0 %v2663_v31 }
 0x160   : > { %2493 = vmatpush3.bf16.msra.mxu1 %v2655_v15  ;;  %1617 = vmatprep.mubr.bf16.mxu1 %v3844_v21 }
 0x161   : > { %1675 = vmatmul.mubr.bf16.gmra.mrb[28].mxu0 %v3845_v43  ;;  %2494 = vmatprep.subr.bf16.mxu1 %v2656_v10 }
 0x162   : > { %1682 = vmatprep.mubr.bf16.mxu0 %v3846_v26  ;;  %2517 = vmatpush3.bf16.msra.mxu0 %v2663_v31 }
 0x163   : > { %2518 = vmatprep.subr.bf16.mxu0 %v2664_v36 }
 0x164   : > { %2495 = vmatpush3.bf16.msra.mxu1 %v2656_v10 }
 0x165   : > { %2496 = vmatprep.subr.bf16.mxu1 %v2657_v4 }
 0x166   : > { %2519 = vmatpush3.bf16.msra.mxu0 %v2664_v36 }
 0x167   : > { %1618 = vmatmul.mubr.bf16.gmra.mrb[24].mxu1 %v3847_v63  ;;  %2520 = vmatprep.subr.bf16.mxu0 %v2665_v56 }
 0x168   : > { %2497 = vmatpush3.bf16.msra.mxu1 %v2657_v4  ;;  %1625 = vmatprep.mubr.bf16.mxu1 %v3848_v48 }
 0x169   : > { %1683 = vmatmul.mubr.bf16.gmra.mrb[32].mxu0 %v777_v37  ;;  %2498 = vmatprep.subr.bf16.mxu1 %v2658_v3 }
 0x16a   : > { %1690 = vmatprep.mubr.bf16.mxu0 %v794_v0  ;;  %2521 = vmatpush3.bf16.msra.mxu0 %v2665_v56 }
 0x16b   : > { %2522 = vmatprep.subr.bf16.mxu0 %v2666_v19 }
 0x16c   : > { %2499 = vmatpush3.bf16.msra.mxu1 %v2658_v3 }
 0x16d   : > { %2500 = vmatprep.subr.bf16.mxu1 %v2659_v58 }
 0x16e   : > { %2523 = vmatpush3.bf16.msra.mxu0 %v2666_v19 }
 0x16f   : > { %1626 = vmatmul.mubr.bf16.gmra.mrb[28].mxu1 %v3849_v27  ;;  %2524 = vmatprep.subr.bf16.mxu0 %v2667_v46 }
 0x170   : > { %2501 = vmatpush3.bf16.msra.mxu1 %v2659_v58  ;;  %2504 = vmatprep.mubr.bf16.mxu1 %v815_v13 }
 0x171   : > { %1691 = vmatmul.mubr.bf16.gmra.mrb[36].mxu0 %v778_v51  ;;  %2502 = vmatprep.subr.bf16.mxu1 %v2660_v61 }
 0x172   : > { %2525 = vmatpush3.bf16.msra.mxu0 %v2667_v46 }
 0x173   : > { %2526 = vmatprep.subr.bf16.mxu0 %v2668_v32 }
 0x174   : > { %2503 = vmatpush3.bf16.msra.mxu1 %v2660_v61 }
 0x175   : > { %2536 = vmatprep.subr.bf16.mxu1 %v2661_v54 }
 0x176   : > { %2527 = vmatpush3.bf16.msra.mxu0 %v2668_v32 }
 0x177   : > { %2505 = vmatmul.mubr.bf16.vlgmr.msra.gmra.mrb[32].mxu1 %v816_v42 }
 0x178   : > { %2508 = vmatprep.mubr.bf16.mxu1 %v817_v38  ;;  %2544 = vmatpush3.bf16.msra.mxu1 %v2661_v54 }
 0x179   : > { %2537 = vmatprep.subr.bf16.mxu1 %v2662_v23 }
 0x17c   : > { %2545 = vmatpush3.bf16.msra.mxu1 %v2662_v23 }
 0x17d   : > { %2538 = vmatprep.subr.bf16.mxu1 %v2663_v31 }
 0x17f   : > { %2509 = vmatmul.mubr.bf16.gmra.mrb[36].mxu1 %v818_v45 }
 0x180   : > { %2546 = vmatpush3.bf16.msra.mxu1 %v2663_v31 }
 0x181   : > { %2539 = vmatprep.subr.bf16.mxu1 %v2664_v36 }
 0x184   : > { %2547 = vmatpush3.bf16.msra.mxu1 %v2664_v36 }
 0x185   : > { %2540 = vmatprep.subr.bf16.mxu1 %v2665_v56 }
 0x188   : > { %2548 = vmatpush3.bf16.msra.mxu1 %v2665_v56 }
 0x189   : > { %2541 = vmatprep.subr.bf16.mxu1 %v2666_v19 }
 0x18c   : > { %2549 = vmatpush3.bf16.msra.mxu1 %v2666_v19 }
 0x18d   : > { %2542 = vmatprep.subr.bf16.mxu1 %v2667_v46 }
 0x190   : > { %2550 = vmatpush3.bf16.msra.mxu1 %v2667_v46 }
 0x191   : > { %2543 = vmatprep.subr.bf16.mxu1 %v2668_v32 }
 0x194   : > { %2551 = vmatpush3.bf16.msra.mxu1 %v2668_v32 }
 0x209   : > { %v2296_v59 = vpop.f32.mrb[0].mxu1 }
 0x20a   : > { %v2297_v44 = vpop.f32.mrb[1].mxu1 }
 0x20b   : > { %v2298_v60 = vadd.f32 %v2297_v44, %v2296_v59  ;;  %v2336_v5 = vpop.f32.mrb[8].mxu0  ;;  %v2299_v40 = vpop.f32.mrb[2].mxu1 }
 0x20c   : > { %v2337_v57 = vpop.f32.mrb[9].mxu0  ;;  %v2300_v50 = vpop.f32.mrb[3].mxu1 }
 0x20d   : > { %v1474_v37 = vadd.f32 %v2298_v60, %v2141_v30  ;;  %v2338_v8 = vadd.f32 %v2337_v57, %v2336_v5  ;;  %v2301_v0 = vadd.f32 %v2300_v50, %v2299_v40  ;;  %v2339_v9 = vpop.f32.mrb[10].mxu0 }
 0x20e   : > { %v2340_v42 = vpop.f32.mrb[11].mxu0 }
 0x20f   : > { %v1539_v49 = vadd.f32 %v2338_v8, %v1474_v37  ;;  %v1477_v51 = vadd.f32 %v2301_v0, %v2141_v30  ;;  %v2341_v34 = vadd.f32 %v2340_v42, %v2339_v9 }
 0x211   : > { %v1542_v52 = vadd.f32 %v2341_v34, %v1477_v51  ;;  %v2302_v53 = vpop.f32.mrb[4].mxu1 }
 0x212   : > { %v2303_v62 = vpop.f32.mrb[5].mxu1 }
 0x213   : > { %v2304_v6 = vadd.f32 %v2303_v62, %v2302_v53  ;;  %v2342_v13 = vpop.f32.mrb[12].mxu0  ;;  %v2305_v55 = vpop.f32.mrb[6].mxu1 }
 0x214   : > { %v2343_v39 = vpop.f32.mrb[13].mxu0  ;;  %v2306_v12 = vpop.f32.mrb[7].mxu1 }
 0x215   : > { %v1482_v38 = vadd.f32 %v2304_v6, %v2141_v30  ;;  %v2344_v14 = vadd.f32 %v2343_v39, %v2342_v13  ;;  %v2307_v45 = vadd.f32 %v2306_v12, %v2305_v55  ;;  %v2345_v16 = vpop.f32.mrb[14].mxu0 }
 0x216   : > { %v2346_v1 = vpop.f32.mrb[15].mxu0 }
 0x217   : > { %v1547_v24 = vadd.f32 %v2344_v14, %v1482_v38  ;;  %v1485_v33 = vadd.f32 %v2307_v45, %v2141_v30  ;;  %v2347_v28 = vadd.f32 %v2346_v1, %v2345_v16 }
 0x219   : > { %v1550_v41 = vadd.f32 %v2347_v28, %v1485_v33  ;;  %v2308_v2 = vpop.f32.mrb[8].mxu1 }
 0x21a   : > { %v2309_v29 = vpop.f32.mrb[9].mxu1 }
 0x21b   : > { %v2310_v25 = vadd.f32 %v2309_v29, %v2308_v2  ;;  %v2311_v17 = vpop.f32.mrb[10].mxu1 }
 0x21c   : > { %v2348_v11 = vpop.f32.mrb[16].mxu0  ;;  %v2312_v20 = vpop.f32.mrb[11].mxu1 }
 0x21d   : > { %v2349_v22 = vpop.f32.mrb[17].mxu0  ;;  %v1490_v7 = vadd.f32 %v2310_v25, %v2141_v30  ;;  %v2313_v18 = vadd.f32 %v2312_v20, %v2311_v17 }
 0x21e   : > { %v2350_v15 = vadd.f32 %v2349_v22, %v2348_v11  ;;  %v2351_v10 = vpop.f32.mrb[18].mxu0 }
 0x21f   : > { %v2352_v35 = vpop.f32.mrb[19].mxu0  ;;  %v1493_v43 = vadd.f32 %v2313_v18, %v2141_v30 }
 0x220   : > { %v1555_v21 = vadd.f32 %v2350_v15, %v1490_v7  ;;  %v2353_v4 = vadd.f32 %v2352_v35, %v2351_v10 }
 0x221   : > { %v2314_v3 = vpop.f32.mrb[12].mxu1 }
 0x222   : > { %v1558_v26 = vadd.f32 %v2353_v4, %v1493_v43  ;;  %v2315_v63 = vpop.f32.mrb[13].mxu1 }
 0x223   : > { %v2316_v48 = vadd.f32 %v2315_v63, %v2314_v3  ;;  %v2317_v61 = vpop.f32.mrb[14].mxu1 }
 0x224   : > { %v2354_v58 = vpop.f32.mrb[20].mxu0  ;;  %v2318_v54 = vpop.f32.mrb[15].mxu1 }
 0x225   : > { %v2355_v27 = vpop.f32.mrb[21].mxu0  ;;  %v1498_v23 = vadd.f32 %v2316_v48, %v2141_v30  ;;  %v2319_v36 = vadd.f32 %v2318_v54, %v2317_v61 }
 0x226   : > { %v2356_v31 = vadd.f32 %v2355_v27, %v2354_v58  ;;  %v2357_v56 = vpop.f32.mrb[22].mxu0 }
 0x227   : > { %v2358_v19 = vpop.f32.mrb[23].mxu0  ;;  %v1501_v32 = vadd.f32 %v2319_v36, %v2141_v30 }
 0x228   : > { %v1563_v46 = vadd.f32 %v2356_v31, %v1498_v23  ;;  %v2359_v59 = vadd.f32 %v2358_v19, %v2357_v56 }
 0x22a   : > { %v1566_v44 = vadd.f32 %v2359_v59, %v1501_v32  ;;  %v2376_v60 = vpop.f32.mrb[16].mxu1 }
 0x22b   : > { %v2377_v5 = vpop.f32.mrb[17].mxu1 }
 0x22c   : > { %v2378_v40 = vadd.f32 %v2377_v5, %v2376_v60  ;;  %v2416_v57 = vpop.f32.mrb[24].mxu0  ;;  %v2379_v50 = vpop.f32.mrb[18].mxu1 }
 0x22d   : > { %v2417_v37 = vpop.f32.mrb[25].mxu0  ;;  %v2380_v8 = vpop.f32.mrb[19].mxu1 }
 0x22e   : > { %v1604_v0 = vadd.f32 %v2378_v40, %v1539_v49  ;;  %v2418_v9 = vadd.f32 %v2417_v37, %v2416_v57  ;;  %v2381_v42 = vadd.f32 %v2380_v8, %v2379_v50  ;;  %v2419_v51 = vpop.f32.mrb[26].mxu0 }
 0x22f   : > { %v2420_v34 = vpop.f32.mrb[27].mxu0 }
 0x230   : > { %v1607_v53 = vadd.f32 %v2381_v42, %v1542_v52  ;;  %v2421_v62 = vadd.f32 %v2420_v34, %v2419_v51  ;;  %v1669_v6 = vadd.f32 %v2418_v9, %v1604_v0 }
 0x232   : > { %v2382_v13 = vpop.f32.mrb[20].mxu1  ;;  %v1672_v55 = vadd.f32 %v2421_v62, %v1607_v53 }
 0x233   : > { %v2383_v30 = vpop.f32.mrb[21].mxu1 }
 0x234   : > { %v2384_v39 = vadd.f32 %v2383_v30, %v2382_v13  ;;  %v2422_v12 = vpop.f32.mrb[28].mxu0  ;;  %v2385_v38 = vpop.f32.mrb[22].mxu1 }
 0x235   : > { %v2423_v14 = vpop.f32.mrb[29].mxu0  ;;  %v2386_v45 = vpop.f32.mrb[23].mxu1 }
 0x236   : > { %v1612_v16 = vadd.f32 %v2384_v39, %v1547_v24  ;;  %v2424_v1 = vadd.f32 %v2423_v14, %v2422_v12  ;;  %v2387_v33 = vadd.f32 %v2386_v45, %v2385_v38  ;;  %v2425_v28 = vpop.f32.mrb[30].mxu0 }
 0x237   : > { %v2426_v49 = vpop.f32.mrb[31].mxu0 }
 0x238   : > { %v1615_v2 = vadd.f32 %v2387_v33, %v1550_v41  ;;  %v2427_v29 = vadd.f32 %v2426_v49, %v2425_v28  ;;  %v1677_v25 = vadd.f32 %v2424_v1, %v1612_v16 }
 0x23a   : > { %v2388_v11 = vpop.f32.mrb[24].mxu1  ;;  %v1680_v52 = vadd.f32 %v2427_v29, %v1615_v2 }
 0x23b   : > { %v2389_v17 = vpop.f32.mrb[25].mxu1 }
 0x23c   : > { %v2390_v22 = vadd.f32 %v2389_v17, %v2388_v11  ;;  %v2428_v20 = vpop.f32.mrb[32].mxu0  ;;  %v2391_v7 = vpop.f32.mrb[26].mxu1 }
 0x23d   : > { %v2429_v15 = vpop.f32.mrb[33].mxu0  ;;  %v2392_v18 = vpop.f32.mrb[27].mxu1 }
 0x23e   : > { %v1620_v10 = vadd.f32 %v2390_v22, %v1555_v21  ;;  %v2430_v35 = vadd.f32 %v2429_v15, %v2428_v20  ;;  %v2393_v43 = vadd.f32 %v2392_v18, %v2391_v7  ;;  %v2431_v4 = vpop.f32.mrb[34].mxu0 }
 0x23f   : > { %v2432_v24 = vpop.f32.mrb[35].mxu0 }
 0x240   : > { %v1623_v3 = vadd.f32 %v2393_v43, %v1558_v26  ;;  %v2433_v63 = vadd.f32 %v2432_v24, %v2431_v4  ;;  %v1685_v48 = vadd.f32 %v2430_v35, %v1620_v10 }
 0x242   : > { %v2394_v58 = vpop.f32.mrb[28].mxu1  ;;  %v1688_v41 = vadd.f32 %v2433_v63, %v1623_v3 }
 0x243   : > { %v2395_v61 = vpop.f32.mrb[29].mxu1 }
 0x244   : > { %v2396_v27 = vadd.f32 %v2395_v61, %v2394_v58  ;;  %v2434_v54 = vpop.f32.mrb[36].mxu0  ;;  %v2397_v23 = vpop.f32.mrb[30].mxu1 }
 0x245   : > { %v2435_v31 = vpop.f32.mrb[37].mxu0  ;;  %v2398_v36 = vpop.f32.mrb[31].mxu1 }
 0x246   : > { %v1628_v56 = vadd.f32 %v2396_v27, %v1563_v46  ;;  %v2436_v19 = vadd.f32 %v2435_v31, %v2434_v54  ;;  %v2399_v32 = vadd.f32 %v2398_v36, %v2397_v23  ;;  %v2437_v59 = vpop.f32.mrb[38].mxu0 }
 0x247   : > { %v2438_v21 = vpop.f32.mrb[39].mxu0 }
 0x248   : > { %v1631_v60 = vadd.f32 %v2399_v32, %v1566_v44  ;;  %v2439_v5 = vadd.f32 %v2438_v21, %v2437_v59  ;;  %v1693_v40 = vadd.f32 %v2436_v19, %v1628_v56  ;;  %v1924_v21 = vld [vmem:[%s3738_s4] sm:$0xff] }
 0x24a   : > { %v2506_v57 = vpop.f32.mrb[32].mxu1  ;;  %v1696_v26 = vadd.f32 %v2439_v5, %v1631_v60 }
 0x24b   : > { %v1742_v50 = vadd.f32 %v2506_v57, %v1677_v25  ;;  %v1733_v37 = vpop.f32.mrb[33].mxu1  ;;  %v2214_v25 = vld [vmem:[%s3741_s7 + $0x2] ss:$0 sm:$0xff] }
 0x24c   : > { %v1734_v8 = vadd.f32 %v1733_v37, %v1669_v6  ;;  %v2507_v0 = vpop.f32.mrb[34].mxu1 }
 0x24d   : > { %v1745_v9 = vadd.f32 %v2507_v0, %v1680_v52  ;;  %v1736_v42 = vpop.f32.mrb[35].mxu1  ;;  %v1766_v34 = vmax.f32 %v1742_v50, 0.0  ;;  %v1932_v50 = vld [vmem:[%s3739_s5] sm:$0xff] }
 0x24e   : > { %v1737_v51 = vadd.f32 %v1736_v42, %v1672_v55  ;;  %v1764_v62 = vmax.f32 %v1734_v8, 0.0  ;;  %v2223_v8 = vld [vmem:[%s3741_s7 + $0x4] ss:$0 sm:$0xff] }
 0x24f   : > { %v1767_v53 = vmax.f32 %v1745_v9, 0.0  ;;  %v1933_v9 = vld [vmem:[%s3739_s5 + $0x8] sm:$0xff] }
 0x250   : > { %v1765_v46 = vmax.f32 %v1737_v51, 0.0 }
 0x251   : > { %v1773_v13 = vpack.c.bf16 %v1767_v53, %v1766_v34 }
 0x252   : > { %v1772_v30 = vpack.c.bf16 %v1765_v46, %v1764_v62  ;;  %v2510_v39 = vpop.f32.mrb[36].mxu1 }
 0x253   : > { %v1758_v12 = vadd.f32 %v2510_v39, %v1693_v40  ;;  %v1749_v44 = vpop.f32.mrb[37].mxu1  ;;  %v1925_v40 = vld [vmem:[%s3738_s4 + $0x8] sm:$0xff] }
 0x254   : > { %v1750_v38 = vadd.f32 %v1749_v44, %v1685_v48  ;;  %v2511_v14 = vpop.f32.mrb[38].mxu1  ;;  %2528 = vmatprep.mubr.bf16.mxu0 %v1772_v30  ;;  %v1946_v30 = vld [vmem:[%s3740_s6] sm:$0xff]  ;;  %v1947_v39 = vld [vmem:[%s3740_s6 + $0x8] sm:$0xff] }
 0x255   : > { %v1761_v45 = vadd.f32 %v2511_v14, %v1696_v26  ;;  %v1752_v16 = vpop.f32.mrb[39].mxu1  ;;  %2529 = vmatmul.mubr.bf16.vlgmr.msra.gmra.mrb[40].mxu0 %v1773_v13  ;;  %v1770_v1 = vmax.f32 %v1758_v12, 0.0  ;;  %v2725_v26 = vmov 0  }
 0x256   : > { %v1753_v6 = vadd.f32 %v1752_v16, %v1688_v41  ;;  %v1768_v28 = vmax.f32 %v1750_v38, 0.0  ;;  %2575 = vset.pattern.permute.xlu1 %v2725_v26  ;;  %2576 = vset.pattern.permute.xlu0 %v2725_v26 }
 0x257   : > { %v1771_v33 = vmax.f32 %v1761_v45, 0.0 }
 0x258   : > { %v1769_v55 = vmax.f32 %v1753_v6, 0.0 }
 0x259   : > { %v1775_v49 = vpack.c.bf16 %v1771_v33, %v1770_v1 }
 0x25a   : > { %v1774_v2 = vpack.c.bf16 %v1769_v55, %v1768_v28  ;;  %v333_v28 = vld [vmem:[%s3741_s7 + $0x3] sm:$0x1] }
 0x25c   : > { %2532 = vmatprep.mubr.bf16.mxu1 %v1774_v2 }
 0x25d   : > { %2533 = vmatmul.mubr.bf16.vlgmr.msra.gmra.mrb[40].mxu1 %v1775_v49 }
 0x328   : > { %v2530_v29 = vpop.f32.mrb[40].mxu0 }
 0x329   : > { %v1878_v11 = vpop.f32.mrb[41].mxu0  ;;  %v3669_v7 = vadd.f32 %v2530_v29, %v2214_v25 }
 0x32a   : > { %v2531_v52 = vpop.f32.mrb[42].mxu0  ;;  %v3665_v22 = vadd.f32 %v2214_v25, %v1878_v11  ;;  %v1976_v11 = vsub.s32 0, %v2856_v47 }
 0x32b   : > { %v1881_v17 = vpop.f32.mrb[43].mxu0  ;;  %v3673_v18 = vadd.f32 %v2531_v52, %v2214_v25 }
 0x32c   : > { %v3667_v20 = vadd.f32 %v2214_v25, %v1881_v17  ;;  %v2677_v17 = vld [vmem:[%s2835_s12] sm:$0xff]  }
 0x32e   : > { %v1909_v15 = vadd.f32 %v3667_v20, %v3665_v22 }
 0x330   : > { %v1910_v10 = vadd.f32 %v1909_v15, %v3669_v7  ;;  %v2534_v35 = vpop.f32.mrb[40].mxu1  ;;  %v1986_v15 = vunpack.c.l.bf16 %v2677_v17 }
 0x331   : > { %v1894_v43 = vpop.f32.mrb[41].mxu1  ;;  %v3682_v41 = vadd.f32 %v2534_v35, %v2214_v25  ;;  %v2678_v35 = vld [vmem:[%s2835_s12 + $0x8] sm:$0xff]  }
 0x332   : > { %v3676_v4 = vadd.f32 %v2214_v25, %v1894_v43  ;;  %v1911_v24 = vadd.f32 %v1910_v10, %v3673_v18  ;;  %v2535_v3 = vpop.f32.mrb[42].mxu1  ;;  %v1987_v10 = vunpack.c.h.bf16 %v2677_v17  ;;  %v1988_v43 = vunpack.c.l.bf16 %v2678_v35 }
 0x333   : > { %v1897_v63 = vpop.f32.mrb[43].mxu1  ;;  %v3685_v27 = vadd.f32 %v2535_v3, %v2214_v25 }
 0x334   : > { %v1912_v48 = vadd.f32 %v1911_v24, %v3676_v4  ;;  %v3680_v58 = vadd.f32 %v2214_v25, %v1897_v63  ;;  %v1989_v24 = vunpack.c.h.bf16 %v2678_v35  ;;  %v2679_v63 = vld [vmem:[%s2835_s12 + $0x10] sm:$0xff]  }
 0x336   : > { %v1913_v61 = vadd.f32 %v1912_v48, %v3680_v58  ;;  %v1990_v48 = vunpack.c.l.bf16 %v2679_v63 }
 0x338   : > { %v1914_v54 = vadd.f32 %v1913_v61, %v3682_v41  ;;  %v1991_v61 = vunpack.c.h.bf16 %v2679_v63 }
 0x33a   : > { %v1915_v23 = vadd.f32 %v1914_v54, %v3685_v27  ;;  %v2680_v54 = vld [vmem:[%s2835_s12 + $0x18] sm:$0xff]  }
 0x33c   : > { %v1916_v31 = vrot.slane %v1915_v23, 4 }
 0x33e   : > { %v1917_v36 = vadd.f32 %v1916_v31, %v1915_v23  ;;  %v1992_v23 = vunpack.c.l.bf16 %v2680_v54  ;;  %v1993_v31 = vunpack.c.h.bf16 %v2680_v54 }
 0x340   : > { %v1918_v56 = vrot.slane %v1917_v36, 2 }
 0x342   : > { %v1919_v19 = vadd.f32 %v1918_v56, %v1917_v36 }
 0x344   : > { %v1920_v32 = vrot.slane %v1919_v19, 1 }
 0x346   : > { %v1921_v59 = vadd.f32 %v1920_v32, %v1919_v19 }
 0x348   : > { %v1923_v60 = vmul.f32 0.015625, %v1921_v59 }
 0x34a   : > { %v1926_v5 = vmul.f32 %v1924_v21, %v1923_v60  ;;  %v1927_v57 = vmul.f32 %v1925_v40, %v1923_v60 }
 0x34c   : > { %1928 = vadd.xlane.f32.xlu0 %v1926_v5 }
 0x350   : > { %1930 = vadd.xlane.f32.xlu0 %v1927_v57 }
 0x3d9   : > { %v1929_v37 = vpop.xlane.xlu0 %1928 }
 0x3da   : > { %v1934_v0 = vadd.f32 %v1932_v50, %v1929_v37 }
 0x3dc   : > { %vm1936_vm2 = vcmp.gt.f32.partialorder %v1934_v0, 0.0  ;;  %v1942_v42 = vmul.f32 %v2223_v8, %v1934_v0 }
 0x3dd   : > { %v1931_v51 = vpop.xlane.xlu0 %1930 }
 0x3de   : > { %v1935_v34 = vadd.f32 %v1933_v9, %v1931_v51  ;;  %v1944_v53 = vsel %vm1936_vm2, %v1934_v0, %v1942_v42 }
 0x3df   : > { %1950 = vperm.xlu1 %2575, %v1944_v53  }
 0x3e0   : > { %v1943_v62 = vmul.f32 %v2223_v8, %v1935_v34  ;;  %vm1937_vm3 = vcmp.gt.f32.partialorder %v1935_v34, 0.0 }
 0x3e2   : > { %v1945_v46 = vsel %vm1937_vm3, %v1935_v34, %v1943_v62 }
 0x3e3   : > { %1955 = vperm.xlu1 %2575, %v1945_v46  }
 0x45e   : > { %v1951_v13 = vpop.permute.xlu1 %1950 }
 0x45f   : > { %v1958_v44 = vmul.f32 %v1951_v13, %v1946_v30 }
 0x462   : > { %v1956_v12 = vpop.permute.xlu1 %1955 }
 0x463   : > { %v1959_v38 = vmul.f32 %v1956_v12, %v1947_v39 }
 0x465   : > { %v1960_v14 = vadd.f32 %v1959_v38, %v1958_v44 }
 0x467   : > { %v1961_v45 = vrot.slane %v1960_v14, 4 }
 0x469   : > { %v1962_v16 = vadd.f32 %v1961_v45, %v1960_v14 }
 0x46b   : > { %v1963_v6 = vrot.slane %v1962_v16, 2 }
 0x46d   : > { %v1964_v1 = vadd.f32 %v1963_v6, %v1962_v16 }
 0x46f   : > { %v1965_v33 = vrot.slane %v1964_v1, 1 }
 0x471   : > { %v1966_v55 = vadd.f32 %v1965_v33, %v1964_v1 }
 0x473   : > { %v1967_v49 = vadd.f32 %v1966_v55, %v333_v28 }
 0x475   : > { %v2224_v2 = vmul.f32 -1.442695, %v1967_v49 }
 0x477   : > { %2673 = vpow2.f32 %v2224_v2 }
 0x481   : > { %v2674_v29 = vpop.eup %2673 }
 0x482   : > { %v1971_v25 = vadd.f32 1.0, %v2674_v29 }
 0x484   : > { %2675 = vrcp.f32 %v1971_v25 }
 0x48e   : > { %v2676_v52 = vpop.eup %2675 }
 0x48f   : > { %v1977_v3 = vrot.slane %v2676_v52, %v1976_v11 }
 0x491   : > { %v1978_v36 = vmul.f32 %v1977_v3, %v3665_v22  ;;  %v1979_v56 = vmul.f32 %v1977_v3, %v3667_v20  ;;  %v1980_v47 = vmul.f32 %v1977_v3, %v3669_v7  ;;  %v1981_v19 = vmul.f32 %v1977_v3, %v3673_v18 }
 0x492   : > { %v1982_v32 = vmul.f32 %v1977_v3, %v3676_v4  ;;  %v1983_v59 = vmul.f32 %v1977_v3, %v3680_v58  ;;  %v1984_v21 = vmul.f32 %v1977_v3, %v3682_v41  ;;  %v1985_v60 = vmul.f32 %v1977_v3, %v3685_v27 }
 0x493   : > { %v1994_v5 = vadd.f32 %v1986_v15, %v1978_v36  ;;  %v1995_v40 = vadd.f32 %v1987_v10, %v1979_v56  ;;  %v1996_v57 = vadd.f32 %v1988_v43, %v1980_v47  ;;  %v1997_v26 = vadd.f32 %v1989_v24, %v1981_v19 }
 0x494   : > { %v1998_v22 = vadd.f32 %v1990_v48, %v1982_v32  ;;  %v1999_v50 = vadd.f32 %v1991_v61, %v1983_v59  ;;  %v2000_v20 = vadd.f32 %v1992_v23, %v1984_v21  ;;  %v2001_v37 = vadd.f32 %v1993_v31, %v1985_v60 }
 0x495   : > { %v2002_v7 = vmax.f32 %v1994_v5, 0.0  ;;  %v2003_v8 = vmax.f32 %v1995_v40, 0.0  ;;  %v2004_v18 = vmax.f32 %v1996_v57, 0.0  ;;  %v2005_v0 = vmax.f32 %v1997_v26, 0.0 }
 0x496   : > { %v2006_v4 = vmax.f32 %v1998_v22, 0.0  ;;  %v2007_v58 = vmax.f32 %v1999_v50, 0.0  ;;  %v2008_v41 = vmax.f32 %v2000_v20, 0.0  ;;  %v2009_v27 = vmax.f32 %v2001_v37, 0.0 }
 0x497   : > { %v2248_v9 = vpack.c.bf16 %v2003_v8, %v2002_v7  ;;  %v2253_v42 = vpack.c.bf16 %v2005_v0, %v2004_v18 }
 0x498   : > { %v2258_v51 = vpack.c.bf16 %v2007_v58, %v2006_v4  ;;  %v2263_v34 = vpack.c.bf16 %v2009_v27, %v2008_v41 }
 0x499   : > { %2249 = vst [vmem:[%s320_s26] sm:$0xff] %v2248_v9   ;;  %2265 = vst [vmem:[%s320_s26 + $0x8] sm:$0xff] %v2253_v42  }
 0x49a   : > { %2266 = vst [vmem:[%s320_s26 + $0x10] sm:$0xff] %v2258_v51   ;;  %2267 = vst [vmem:[%s320_s26 + $0x18] sm:$0xff] %v2263_v34  }
 0x49b PF: > { %s19_s27 = sadd.s32 1, %s2719_s27  }
 0x49c   : > { %p16_p3 = scmp.ge.s32.totalorder %s19_s27, 4  }
 0x49e   :  { %18 = sbr.rel (!%p16_p3) target bundleno = 1 (0x1), region = 87 }
 0x4a5   :  { %2071 = vsyncpa [#allocation4], 1 }
 0x4a6   :  { %2073 = vsyncpa [#allocation4 + $0x1], 1 }

</bundles_post_ra>
